<compile_context>
chip_gen: v5e
topology: v5e:2x2
jax: 0.10.0
libtpu: 0.0.40
codegen_flags: <defaults>
</compile_context>

<pallas_src>
import functools
import math

import jax
import jax.numpy as jnp
from jax.experimental import pallas as pl
from jax.experimental.pallas import tpu as pltpu

# ----------------------- tiny-BERT configuration ---------------------------
VOCAB = 100
VOCAB_PAD = 128            # lane-aligned vocab for the one-hot gather matmul
MAX_POS = 64
TYPE_VOCAB = 2
HIDDEN = 32
N_LAYERS = 2
N_HEADS = 4
HEAD_DIM = HIDDEN // N_HEADS
INTERMEDIATE = 64
LN_EPS = 1e-12


# ------------------------------ math helpers --------------------------------
def _gelu(x):
    return 0.5 * x * (1.0 + jnp.tanh(0.7978845608028654 *
                                     (x + 0.044715 * x * x * x)))


def _layernorm(x, g, b):
    mean = jnp.mean(x, axis=-1, keepdims=True)
    xc = x - mean
    var = jnp.mean(xc * xc, axis=-1, keepdims=True)
    return xc * jax.lax.rsqrt(var + LN_EPS) * g + b


# ------------------------- fused encoder kernel -----------------------------
def _encoder_kernel(ids_ref, att_ref, pos_type_ref, emb_g_ref, emb_b_ref,
                    wemb_ref,
                    wq_ref, wk_ref, wv_ref, bq_ref, bk_ref, bv_ref,
                    wo_ref, bo_ref, ln1g_ref, ln1b_ref,
                    w1_ref, b1_ref, w2_ref, b2_ref, ln2g_ref, ln2b_ref,
                    out_ref, *, seq, n_layers, n_heads, head_dim):
    """One grid step = one sequence (S rows) of the batch."""
    d = HIDDEN
    vocab_pad = wemb_ref.shape[0]
    wdtype = wemb_ref.dtype                                     # bfloat16

    # ---- embeddings: gather implemented as a one-hot matmul on the MXU -----
    ids = ids_ref[0]                                            # (S, 1) int32
    vocab_iota = jax.lax.broadcasted_iota(jnp.int32, (seq, vocab_pad), 1)
    one_hot = (vocab_iota == ids).astype(wdtype)                # (S, Vpad)
    x = jnp.dot(one_hot, wemb_ref[...],
                preferred_element_type=jnp.float32)             # (S, D) f32
    x = x + pos_type_ref[...]                                   # pos + type0
    h = _layernorm(x, emb_g_ref[...], emb_b_ref[...])           # (S, D) f32

    # additive attention mask, built once from the (1, S) float mask
    mask_add = (1.0 - att_ref[0]) * -1e9                        # (1, S)
    scale = 1.0 / math.sqrt(head_dim)

    for li in range(n_layers):                                  # static unroll
        # --- multi-head attention with an explicit head batch dim ----------
        hb = jnp.broadcast_to(h.astype(wdtype)[None],
                              (n_heads, seq, d))                 # (H, S, D)
        q = jnp.einsum('hsd,hdk->hsk', hb, wq_ref[li],
                       preferred_element_type=jnp.float32) + bq_ref[li]
        k = jnp.einsum('hsd,hdk->hsk', hb, wk_ref[li],
                       preferred_element_type=jnp.float32) + bk_ref[li]
        v = jnp.einsum('hsd,hdk->hsk', hb, wv_ref[li],
                       preferred_element_type=jnp.float32) + bv_ref[li]

        s = jnp.einsum('hqd,hkd->hqk', q, k,
                       preferred_element_type=jnp.float32) * scale
        s = s + mask_add[None, :, :]                             # (H, S, S)
        s = s - jnp.max(s, axis=-1, keepdims=True)
        p = jnp.exp(s)
        denom = jnp.sum(p, axis=-1, keepdims=True)
        p = p * pl.reciprocal(denom, approx=True)                # EUP divide
        ctx = jnp.einsum('hqk,hkd->hqd', p, v,
                         preferred_element_type=jnp.float32)     # (H, S, Dh)

        # single batched output projection, then reduce over heads
        attn = jnp.einsum('hsd,hdo->hso', ctx.astype(wdtype), wo_ref[li],
                          preferred_element_type=jnp.float32)    # (H, S, D)
        attn = jnp.sum(attn, axis=0) + bo_ref[li]                # (S, D)
        h = _layernorm(attn + h, ln1g_ref[li], ln1b_ref[li])

        # --- feed-forward ----------------------------------------------------
        inter = jnp.dot(h.astype(wdtype), w1_ref[li],
                        preferred_element_type=jnp.float32) + b1_ref[li]
        inter = _gelu(inter)                                     # f32 (v5e ok)
        ffn = jnp.dot(inter.astype(wdtype), w2_ref[li],
                      preferred_element_type=jnp.float32) + b2_ref[li]
        h = _layernorm(ffn + h, ln2g_ref[li], ln2b_ref[li])

    # em_dropout(p=0.5) is identity in eval mode.
    out_ref[0] = h.astype(out_ref.dtype)


# --------------------------- parameter creation ------------------------------
def init_params(key):
    def normal(k, shape):
        return 0.02 * jax.random.normal(k, shape, dtype=jnp.float32)

    keys = jax.random.split(key, 3 + N_LAYERS)
    params = {
        "word_emb": normal(keys[0], (VOCAB, HIDDEN)),
        "pos_emb": normal(keys[1], (MAX_POS, HIDDEN)),
        "type_emb": normal(keys[2], (TYPE_VOCAB, HIDDEN)),
        "emb_ln_g": jnp.ones((HIDDEN,), jnp.float32),
        "emb_ln_b": jnp.zeros((HIDDEN,), jnp.float32),
        "layers": [],
    }
    for li in range(N_LAYERS):
        lk = jax.random.split(keys[3 + li], 6)
        params["layers"].append({
            "wq": normal(lk[0], (HIDDEN, HIDDEN)), "bq": jnp.zeros((HIDDEN,), jnp.float32),
            "wk": normal(lk[1], (HIDDEN, HIDDEN)), "bk": jnp.zeros((HIDDEN,), jnp.float32),
            "wv": normal(lk[2], (HIDDEN, HIDDEN)), "bv": jnp.zeros((HIDDEN,), jnp.float32),
            "wo": normal(lk[3], (HIDDEN, HIDDEN)), "bo": jnp.zeros((HIDDEN,), jnp.float32),
            "ln1_g": jnp.ones((HIDDEN,), jnp.float32), "ln1_b": jnp.zeros((HIDDEN,), jnp.float32),
            "w1": normal(lk[4], (HIDDEN, INTERMEDIATE)), "b1": jnp.zeros((INTERMEDIATE,), jnp.float32),
            "w2": normal(lk[5], (INTERMEDIATE, HIDDEN)), "b2": jnp.zeros((HIDDEN,), jnp.float32),
            "ln2_g": jnp.ones((HIDDEN,), jnp.float32), "ln2_b": jnp.zeros((HIDDEN,), jnp.float32),
        })
    return params


def pack_params(params):
    """Pack weights into kernel-friendly, head-major, bf16 arrays (done once)."""
    layers = params["layers"]
    H, Dh, D = N_HEADS, HEAD_DIM, HIDDEN
    bf16 = jnp.bfloat16

    def heads_in(w):        # (D, D) -> (H, D, Dh): output columns per head
        return w.reshape(D, H, Dh).transpose(1, 0, 2)

    def heads_bias(b):      # (D,) -> (H, 1, Dh)
        return b.reshape(H, Dh)[:, None, :]

    def heads_out(w):       # (D, D) -> (H, Dh, D): input rows per head
        return w.reshape(H, Dh, D)

    def stack_vec(key):     # (L, 1, .)
        return jnp.stack([l[key][None, :] for l in layers])

    word_emb_pad = jnp.zeros((VOCAB_PAD, D), jnp.float32).at[:VOCAB].set(
        params["word_emb"])

    return {
        # embeddings
        "word_emb": word_emb_pad.astype(bf16),                       # (128, D)
        "pos_emb": params["pos_emb"],                                # (MAX_POS, D)
        "type0": params["type_emb"][0][None, :],                     # (1, D)
        "emb_ln_g": params["emb_ln_g"][None, :],                     # (1, D)
        "emb_ln_b": params["emb_ln_b"][None, :],                     # (1, D)
        # attention (head-major)
        "wq": jnp.stack([heads_in(l["wq"]) for l in layers]).astype(bf16),   # (L,H,D,Dh)
        "wk": jnp.stack([heads_in(l["wk"]) for l in layers]).astype(bf16),
        "wv": jnp.stack([heads_in(l["wv"]) for l in layers]).astype(bf16),
        "bq": jnp.stack([heads_bias(l["bq"]) for l in layers]),             # (L,H,1,Dh)
        "bk": jnp.stack([heads_bias(l["bk"]) for l in layers]),
        "bv": jnp.stack([heads_bias(l["bv"]) for l in layers]),
        "wo": jnp.stack([heads_out(l["wo"]) for l in layers]).astype(bf16), # (L,H,Dh,D)
        "bo": stack_vec("bo"),                                               # (L,1,D)
        "ln1_g": stack_vec("ln1_g"), "ln1_b": stack_vec("ln1_b"),
        # feed-forward
        "w1": jnp.stack([l["w1"] for l in layers]).astype(bf16),            # (L,D,I)
        "b1": stack_vec("b1"),                                               # (L,1,I)
        "w2": jnp.stack([l["w2"] for l in layers]).astype(bf16),            # (L,I,D)
        "b2": stack_vec("b2"),
        "ln2_g": stack_vec("ln2_g"), "ln2_b": stack_vec("ln2_b"),
    }


# ------------------------------- forward pass -------------------------------
def bert_encoder_forward(packed, input_ids, attention_mask=None):
    B, S = input_ids.shape
    if attention_mask is None:
        attention_mask = jnp.ones((B, S), dtype=jnp.int32)

    ids3d = input_ids.reshape(B, S, 1).astype(jnp.int32)           # (B, S, 1)
    mask3d = attention_mask.astype(jnp.float32).reshape(B, 1, S)   # (B, 1, S)
    # position + token-type-0 embeddings merged once outside the kernel
    pos_type = packed["pos_emb"][:S] + packed["type0"]             # (S, D) f32

    def resident(arr):
        # Full-array block, constant index_map: stays VMEM-resident across
        # the (parallel) batch grid, no re-fetch per step.
        nd = arr.ndim
        return pl.BlockSpec(arr.shape, lambda b, _nd=nd: (0,) * _nd)

    weight_args = (pos_type, packed["emb_ln_g"], packed["emb_ln_b"],
                   packed["word_emb"],
                   packed["wq"], packed["wk"], packed["wv"],
                   packed["bq"], packed["bk"], packed["bv"],
                   packed["wo"], packed["bo"],
                   packed["ln1_g"], packed["ln1_b"],
                   packed["w1"], packed["b1"], packed["w2"], packed["b2"],
                   packed["ln2_g"], packed["ln2_b"])

    in_specs = [pl.BlockSpec((1, S, 1), lambda b: (b, 0, 0)),      # ids
                pl.BlockSpec((1, 1, S), lambda b: (b, 0, 0))]      # mask
    in_specs += [resident(w) for w in weight_args]

    kernel = functools.partial(_encoder_kernel, seq=S, n_layers=N_LAYERS,
                               n_heads=N_HEADS, head_dim=HEAD_DIM)

    out = pl.pallas_call(
        kernel,
        grid=(B,),
        in_specs=in_specs,
        out_specs=pl.BlockSpec((1, S, HIDDEN), lambda b: (b, 0, 0)),
        out_shape=jax.ShapeDtypeStruct((B, S, HIDDEN), jnp.float32),
        compiler_params=pltpu.CompilerParams(
            dimension_semantics=("parallel",),
            vmem_limit_bytes=32 * 1024 * 1024),
    )(ids3d, mask3d, *weight_args)
    return out


# --------------------------- pure-JAX reference ------------------------------
def reference_forward(params, input_ids, attention_mask):
    B, S = input_ids.shape

    def ln(x, g, b):
        mu = x.mean(-1, keepdims=True)
        xc = x - mu
        var = (xc * xc).mean(-1, keepdims=True)
        return xc / jnp.sqrt(var + LN_EPS) * g + b

    x = (jnp.take(params["word_emb"], input_ids, axis=0)
         + params["pos_emb"][None, :S, :]
         + params["type_emb"][0][None, None, :])
    h = ln(x, params["emb_ln_g"], params["emb_ln_b"])
    mask = (1.0 - attention_mask.astype(jnp.float32)) * -1e9
    scale = 1.0 / math.sqrt(HEAD_DIM)

    def split(t):
        return t.reshape(B, S, N_HEADS, HEAD_DIM).transpose(0, 2, 1, 3)

    for l in params["layers"]:
        q = split(h @ l["wq"] + l["bq"])
        k = split(h @ l["wk"] + l["bk"])
        v = split(h @ l["wv"] + l["bv"])
        s = jnp.einsum("bhqd,bhkd->bhqk", q, k) * scale + mask[:, None, None, :]
        p = jax.nn.softmax(s, axis=-1)
        ctx = jnp.einsum("bhqk,bhkd->bhqd", p, v).transpose(0, 2, 1, 3)
        ctx = ctx.reshape(B, S, HIDDEN)
        h = ln(ctx @ l["wo"] + l["bo"] + h, l["ln1_g"], l["ln1_b"])
        inter = _gelu(h @ l["w1"] + l["b1"])
        h = ln(inter @ l["w2"] + l["b2"] + h, l["ln2_g"], l["ln2_b"])
    return h


# ------------------------------------ main -----------------------------------
if __name__ == "__main__":
    key = jax.random.PRNGKey(0)
    pkey, ikey = jax.random.split(key)
    params = init_params(pkey)
    packed = pack_params(params)

    B, S = 2, 8
    input_ids = jax.random.randint(ikey, (B, S), 0, VOCAB, dtype=jnp.int32)
    attention_mask = jnp.ones((B, S), dtype=jnp.int32)
    attention_mask = attention_mask.at[1, 6:].set(0)   # some padding in batch 1

    embedded = bert_encoder_forward(packed, input_ids, attention_mask)
    jax.block_until_ready(embedded)

    assert embedded.shape == (B, S, HIDDEN)
    assert bool(jnp.all(jnp.isfinite(embedded)))

    ref = reference_forward(params, input_ids, attention_mask)
    max_err = float(jnp.max(jnp.abs(embedded - ref)))
    assert max_err < 5e-2, f"mismatch vs reference: {max_err}"

    print("KERNEL_OK")
</pallas_src>

<mosaic_0001>
module attributes {stable_mosaic.version = 11 : i64} {
  func.func @_encoder_kernel(%arg0: i32, %arg1: memref<1x8x1xi32, #tpu.memory_space<vmem>>, %arg2: memref<1x1x8xf32, #tpu.memory_space<vmem>>, %arg3: memref<8x32xf32, #tpu.memory_space<vmem>>, %arg4: memref<1x32xf32, #tpu.memory_space<vmem>>, %arg5: memref<1x32xf32, #tpu.memory_space<vmem>>, %arg6: memref<128x32xbf16, #tpu.memory_space<vmem>>, %arg7: memref<2x4x32x8xbf16, #tpu.memory_space<vmem>>, %arg8: memref<2x4x32x8xbf16, #tpu.memory_space<vmem>>, %arg9: memref<2x4x32x8xbf16, #tpu.memory_space<vmem>>, %arg10: memref<2x4x1x8xf32, #tpu.memory_space<vmem>>, %arg11: memref<2x4x1x8xf32, #tpu.memory_space<vmem>>, %arg12: memref<2x4x1x8xf32, #tpu.memory_space<vmem>>, %arg13: memref<2x4x8x32xbf16, #tpu.memory_space<vmem>>, %arg14: memref<2x1x32xf32, #tpu.memory_space<vmem>>, %arg15: memref<2x1x32xf32, #tpu.memory_space<vmem>>, %arg16: memref<2x1x32xf32, #tpu.memory_space<vmem>>, %arg17: memref<2x32x64xbf16, #tpu.memory_space<vmem>>, %arg18: memref<2x1x64xf32, #tpu.memory_space<vmem>>, %arg19: memref<2x64x32xbf16, #tpu.memory_space<vmem>>, %arg20: memref<2x1x32xf32, #tpu.memory_space<vmem>>, %arg21: memref<2x1x32xf32, #tpu.memory_space<vmem>>, %arg22: memref<2x1x32xf32, #tpu.memory_space<vmem>>, %arg23: memref<1x8x32xf32, #tpu.memory_space<vmem>>) attributes {dimension_semantics = [#tpu.dimension_semantics<parallel>], iteration_bounds = array<i64: 2>, scalar_prefetch = 0 : i64, scratch_operands = 0 : i64, tpu.core_type = #tpu.core_type<tc>, window_params = [{transform_indices = @transform_0, window_bounds = array<i64: 1, 8, 1>}, {transform_indices = @transform_1, window_bounds = array<i64: 1, 1, 8>}, {pipeline_mode = #tpu.pipeline_mode<synchronous>, transform_indices = @transform_2, window_bounds = array<i64: 8, 32>}, {pipeline_mode = #tpu.pipeline_mode<synchronous>, transform_indices = @transform_3, window_bounds = array<i64: 1, 32>}, {pipeline_mode = #tpu.pipeline_mode<synchronous>, transform_indices = @transform_4, window_bounds = array<i64: 1, 32>}, {pipeline_mode = #tpu.pipeline_mode<synchronous>, transform_indices = @transform_5, window_bounds = array<i64: 128, 32>}, {pipeline_mode = #tpu.pipeline_mode<synchronous>, transform_indices = @transform_6, window_bounds = array<i64: 2, 4, 32, 8>}, {pipeline_mode = #tpu.pipeline_mode<synchronous>, transform_indices = @transform_7, window_bounds = array<i64: 2, 4, 32, 8>}, {pipeline_mode = #tpu.pipeline_mode<synchronous>, transform_indices = @transform_8, window_bounds = array<i64: 2, 4, 32, 8>}, {pipeline_mode = #tpu.pipeline_mode<synchronous>, transform_indices = @transform_9, window_bounds = array<i64: 2, 4, 1, 8>}, {pipeline_mode = #tpu.pipeline_mode<synchronous>, transform_indices = @transform_10, window_bounds = array<i64: 2, 4, 1, 8>}, {pipeline_mode = #tpu.pipeline_mode<synchronous>, transform_indices = @transform_11, window_bounds = array<i64: 2, 4, 1, 8>}, {pipeline_mode = #tpu.pipeline_mode<synchronous>, transform_indices = @transform_12, window_bounds = array<i64: 2, 4, 8, 32>}, {pipeline_mode = #tpu.pipeline_mode<synchronous>, transform_indices = @transform_13, window_bounds = array<i64: 2, 1, 32>}, {pipeline_mode = #tpu.pipeline_mode<synchronous>, transform_indices = @transform_14, window_bounds = array<i64: 2, 1, 32>}, {pipeline_mode = #tpu.pipeline_mode<synchronous>, transform_indices = @transform_15, window_bounds = array<i64: 2, 1, 32>}, {pipeline_mode = #tpu.pipeline_mode<synchronous>, transform_indices = @transform_16, window_bounds = array<i64: 2, 32, 64>}, {pipeline_mode = #tpu.pipeline_mode<synchronous>, transform_indices = @transform_17, window_bounds = array<i64: 2, 1, 64>}, {pipeline_mode = #tpu.pipeline_mode<synchronous>, transform_indices = @transform_18, window_bounds = array<i64: 2, 64, 32>}, {pipeline_mode = #tpu.pipeline_mode<synchronous>, transform_indices = @transform_19, window_bounds = array<i64: 2, 1, 32>}, {pipeline_mode = #tpu.pipeline_mode<synchronous>, transform_indices = @transform_20, window_bounds = array<i64: 2, 1, 32>}, {pipeline_mode = #tpu.pipeline_mode<synchronous>, transform_indices = @transform_21, window_bounds = array<i64: 2, 1, 32>}, {transform_indices = @transform_22, window_bounds = array<i64: 1, 8, 32>}]} {
    %c0 = arith.constant 0 : index
    %c0_0 = arith.constant 0 : index
    %c0_1 = arith.constant 0 : index
    %0 = vector.load %arg1[%c0, %c0_0, %c0_1] : memref<1x8x1xi32, #tpu.memory_space<vmem>>, vector<1x8x1xi32>
    %1 = vector.shape_cast %0 : vector<1x8x1xi32> to vector<8x1xi32>
    %2 = tpu.iota {dimensions = array<i32: 1>} : vector<8x128xi32>
    %3 = vector.broadcast %1 : vector<8x1xi32> to vector<8x128xi32>
    %4 = arith.cmpi eq, %2, %3 : vector<8x128xi32>
    %5 = arith.extui %4 : vector<8x128xi1> to vector<8x128xi32>
    %6 = arith.sitofp %5 : vector<8x128xi32> to vector<8x128xf32>
    %7 = arith.truncf %6 : vector<8x128xf32> to vector<8x128xbf16>
    %c0_2 = arith.constant 0 : index
    %c0_3 = arith.constant 0 : index
    %8 = vector.load %arg6[%c0_2, %c0_3] : memref<128x32xbf16, #tpu.memory_space<vmem>>, vector<128x32xbf16>
    %cst = arith.constant dense<0.000000e+00> : vector<8x32xf32>
    %9 = tpu.matmul %7, %8, %cst {dimension_numbers = #tpu.dot_dimension_numbers<[1], [0], [0], [1], [0, 0, 1, 1], [], []>} : vector<8x128xbf16>, vector<128x32xbf16>, vector<8x32xf32> -> vector<8x32xf32>
    %c0_4 = arith.constant 0 : index
    %c0_5 = arith.constant 0 : index
    %10 = vector.load %arg3[%c0_4, %c0_5] : memref<8x32xf32, #tpu.memory_space<vmem>>, vector<8x32xf32>
    %11 = arith.addf %9, %10 : vector<8x32xf32>
    %c0_6 = arith.constant 0 : index
    %c0_7 = arith.constant 0 : index
    %12 = vector.load %arg4[%c0_6, %c0_7] : memref<1x32xf32, #tpu.memory_space<vmem>>, vector<1x32xf32>
    %c0_8 = arith.constant 0 : index
    %c0_9 = arith.constant 0 : index
    %13 = vector.load %arg5[%c0_8, %c0_9] : memref<1x32xf32, #tpu.memory_space<vmem>>, vector<1x32xf32>
    %cst_10 = arith.constant dense<0.000000e+00> : vector<8xf32>
    %14 = vector.multi_reduction <add>, %11, %cst_10 [1] : vector<8x32xf32> to vector<8xf32>
    %15 = vector.shape_cast %14 : vector<8xf32> to vector<8x1xf32>
    %cst_11 = arith.constant 3.200000e+01 : f32
    %16 = vector.broadcast %cst_11 : f32 to vector<8x1xf32>
    %17 = arith.divf %15, %16 : vector<8x1xf32>
    %18 = vector.broadcast %17 : vector<8x1xf32> to vector<8x32xf32>
    %19 = arith.subf %11, %18 : vector<8x32xf32>
    %20 = arith.mulf %19, %19 : vector<8x32xf32>
    %cst_12 = arith.constant dense<0.000000e+00> : vector<8xf32>
    %21 = vector.multi_reduction <add>, %20, %cst_12 [1] : vector<8x32xf32> to vector<8xf32>
    %22 = vector.shape_cast %21 : vector<8xf32> to vector<8x1xf32>
    %cst_13 = arith.constant 3.200000e+01 : f32
    %23 = vector.broadcast %cst_13 : f32 to vector<8x1xf32>
    %24 = arith.divf %22, %23 : vector<8x1xf32>
    %cst_14 = arith.constant 9.99999996E-13 : f32
    %25 = vector.broadcast %cst_14 : f32 to vector<8x1xf32>
    %26 = arith.addf %24, %25 : vector<8x1xf32>
    %27 = math.rsqrt %26 : vector<8x1xf32>
    %28 = vector.broadcast %27 : vector<8x1xf32> to vector<8x32xf32>
    %29 = arith.mulf %19, %28 : vector<8x32xf32>
    %30 = vector.broadcast %12 : vector<1x32xf32> to vector<8x32xf32>
    %31 = arith.mulf %29, %30 : vector<8x32xf32>
    %32 = vector.broadcast %13 : vector<1x32xf32> to vector<8x32xf32>
    %33 = arith.addf %31, %32 : vector<8x32xf32>
    %c0_15 = arith.constant 0 : index
    %c0_16 = arith.constant 0 : index
    %c0_17 = arith.constant 0 : index
    %34 = vector.load %arg2[%c0_15, %c0_16, %c0_17] : memref<1x1x8xf32, #tpu.memory_space<vmem>>, vector<1x1x8xf32>
    %35 = vector.shape_cast %34 : vector<1x1x8xf32> to vector<1x8xf32>
    %cst_18 = arith.constant 1.000000e+00 : f32
    %36 = vector.broadcast %cst_18 : f32 to vector<1x8xf32>
    %37 = arith.subf %36, %35 : vector<1x8xf32>
    %cst_19 = arith.constant -1.000000e+09 : f32
    %38 = vector.broadcast %cst_19 : f32 to vector<1x8xf32>
    %39 = arith.mulf %37, %38 : vector<1x8xf32>
    %40 = arith.truncf %33 : vector<8x32xf32> to vector<8x32xbf16>
    %41 = vector.shape_cast %40 : vector<8x32xbf16> to vector<1x8x32xbf16>
    %42 = vector.shape_cast %41 : vector<1x8x32xbf16> to vector<1x8x32xbf16>
    %43 = vector.broadcast %42 : vector<1x8x32xbf16> to vector<4x8x32xbf16>
    %c0_20 = arith.constant 0 : index
    %c0_21 = arith.constant 0 : index
    %c0_22 = arith.constant 0 : index
    %c0_23 = arith.constant 0 : index
    %44 = vector.load %arg7[%c0_20, %c0_21, %c0_22, %c0_23] : memref<2x4x32x8xbf16, #tpu.memory_space<vmem>>, vector<1x4x32x8xbf16>
    %45 = vector.shape_cast %44 : vector<1x4x32x8xbf16> to vector<4x32x8xbf16>
    "tpu.trace_start"() <{level = 10 : i32, message = "hsd,hdk->hsk"}> : () -> ()
    %cst_24 = arith.constant dense<0.000000e+00> : vector<4x8x8xf32>
    %46 = tpu.matmul %43, %45, %cst_24 {dimension_numbers = #tpu.dot_dimension_numbers<[2], [1], [1], [2], [0, 0, 0, 1, 1, 2], [0], [0]>} : vector<4x8x32xbf16>, vector<4x32x8xbf16>, vector<4x8x8xf32> -> vector<4x8x8xf32>
    "tpu.trace_stop"() : () -> ()
    %c0_25 = arith.constant 0 : index
    %c0_26 = arith.constant 0 : index
    %c0_27 = arith.constant 0 : index
    %c0_28 = arith.constant 0 : index
    %47 = vector.load %arg10[%c0_25, %c0_26, %c0_27, %c0_28] : memref<2x4x1x8xf32, #tpu.memory_space<vmem>>, vector<1x4x1x8xf32>
    %48 = vector.shape_cast %47 : vector<1x4x1x8xf32> to vector<4x1x8xf32>
    %49 = vector.broadcast %48 : vector<4x1x8xf32> to vector<4x8x8xf32>
    %50 = arith.addf %46, %49 : vector<4x8x8xf32>
    %c0_29 = arith.constant 0 : index
    %c0_30 = arith.constant 0 : index
    %c0_31 = arith.constant 0 : index
    %c0_32 = arith.constant 0 : index
    %51 = vector.load %arg8[%c0_29, %c0_30, %c0_31, %c0_32] : memref<2x4x32x8xbf16, #tpu.memory_space<vmem>>, vector<1x4x32x8xbf16>
    %52 = vector.shape_cast %51 : vector<1x4x32x8xbf16> to vector<4x32x8xbf16>
    "tpu.trace_start"() <{level = 10 : i32, message = "hsd,hdk->hsk"}> : () -> ()
    %cst_33 = arith.constant dense<0.000000e+00> : vector<4x8x8xf32>
    %53 = tpu.matmul %43, %52, %cst_33 {dimension_numbers = #tpu.dot_dimension_numbers<[2], [1], [1], [2], [0, 0, 0, 1, 1, 2], [0], [0]>} : vector<4x8x32xbf16>, vector<4x32x8xbf16>, vector<4x8x8xf32> -> vector<4x8x8xf32>
    "tpu.trace_stop"() : () -> ()
    %c0_34 = arith.constant 0 : index
    %c0_35 = arith.constant 0 : index
    %c0_36 = arith.constant 0 : index
    %c0_37 = arith.constant 0 : index
    %54 = vector.load %arg11[%c0_34, %c0_35, %c0_36, %c0_37] : memref<2x4x1x8xf32, #tpu.memory_space<vmem>>, vector<1x4x1x8xf32>
    %55 = vector.shape_cast %54 : vector<1x4x1x8xf32> to vector<4x1x8xf32>
    %56 = vector.broadcast %55 : vector<4x1x8xf32> to vector<4x8x8xf32>
    %57 = arith.addf %53, %56 : vector<4x8x8xf32>
    %c0_38 = arith.constant 0 : index
    %c0_39 = arith.constant 0 : index
    %c0_40 = arith.constant 0 : index
    %c0_41 = arith.constant 0 : index
    %58 = vector.load %arg9[%c0_38, %c0_39, %c0_40, %c0_41] : memref<2x4x32x8xbf16, #tpu.memory_space<vmem>>, vector<1x4x32x8xbf16>
    %59 = vector.shape_cast %58 : vector<1x4x32x8xbf16> to vector<4x32x8xbf16>
    "tpu.trace_start"() <{level = 10 : i32, message = "hsd,hdk->hsk"}> : () -> ()
    %cst_42 = arith.constant dense<0.000000e+00> : vector<4x8x8xf32>
    %60 = tpu.matmul %43, %59, %cst_42 {dimension_numbers = #tpu.dot_dimension_numbers<[2], [1], [1], [2], [0, 0, 0, 1, 1, 2], [0], [0]>} : vector<4x8x32xbf16>, vector<4x32x8xbf16>, vector<4x8x8xf32> -> vector<4x8x8xf32>
    "tpu.trace_stop"() : () -> ()
    %c0_43 = arith.constant 0 : index
    %c0_44 = arith.constant 0 : index
    %c0_45 = arith.constant 0 : index
    %c0_46 = arith.constant 0 : index
    %61 = vector.load %arg12[%c0_43, %c0_44, %c0_45, %c0_46] : memref<2x4x1x8xf32, #tpu.memory_space<vmem>>, vector<1x4x1x8xf32>
    %62 = vector.shape_cast %61 : vector<1x4x1x8xf32> to vector<4x1x8xf32>
    %63 = vector.broadcast %62 : vector<4x1x8xf32> to vector<4x8x8xf32>
    %64 = arith.addf %60, %63 : vector<4x8x8xf32>
    "tpu.trace_start"() <{level = 10 : i32, message = "hqd,hkd->hqk"}> : () -> ()
    %cst_47 = arith.constant dense<0.000000e+00> : vector<4x8x8xf32>
    %65 = tpu.matmul %50, %57, %cst_47 {dimension_numbers = #tpu.dot_dimension_numbers<[2], [2], [1], [1], [0, 0, 0, 1, 1, 1], [0], [0]>} : vector<4x8x8xf32>, vector<4x8x8xf32>, vector<4x8x8xf32> -> vector<4x8x8xf32>
    "tpu.trace_stop"() : () -> ()
    %cst_48 = arith.constant 0.353553385 : f32
    %66 = vector.broadcast %cst_48 : f32 to vector<4x8x8xf32>
    %67 = arith.mulf %65, %66 : vector<4x8x8xf32>
    %68 = vector.shape_cast %39 : vector<1x8xf32> to vector<1x1x8xf32>
    %69 = vector.broadcast %68 : vector<1x1x8xf32> to vector<4x8x8xf32>
    %70 = arith.addf %67, %69 : vector<4x8x8xf32>
    %cst_49 = arith.constant dense<0xFF800000> : vector<4x8xf32>
    %71 = vector.multi_reduction <maximumf>, %70, %cst_49 [2] : vector<4x8x8xf32> to vector<4x8xf32>
    %72 = vector.shape_cast %71 : vector<4x8xf32> to vector<4x8x1xf32>
    %73 = vector.broadcast %72 : vector<4x8x1xf32> to vector<4x8x8xf32>
    %74 = arith.subf %70, %73 : vector<4x8x8xf32>
    %75 = math.exp %74 : vector<4x8x8xf32>
    %cst_50 = arith.constant dense<0.000000e+00> : vector<4x8xf32>
    %76 = vector.multi_reduction <add>, %75, %cst_50 [2] : vector<4x8x8xf32> to vector<4x8xf32>
    %77 = vector.shape_cast %76 : vector<4x8xf32> to vector<4x8x1xf32>
    %78 = tpu.reciprocal %77 {approx = true} : vector<4x8x1xf32> -> vector<4x8x1xf32>
    %79 = vector.broadcast %78 : vector<4x8x1xf32> to vector<4x8x8xf32>
    %80 = arith.mulf %75, %79 : vector<4x8x8xf32>
    "tpu.trace_start"() <{level = 10 : i32, message = "hqk,hkd->hqd"}> : () -> ()
    %cst_51 = arith.constant dense<0.000000e+00> : vector<4x8x8xf32>
    %81 = tpu.matmul %80, %64, %cst_51 {dimension_numbers = #tpu.dot_dimension_numbers<[2], [1], [1], [2], [0, 0, 0, 1, 1, 2], [0], [0]>} : vector<4x8x8xf32>, vector<4x8x8xf32>, vector<4x8x8xf32> -> vector<4x8x8xf32>
    "tpu.trace_stop"() : () -> ()
    %82 = arith.truncf %81 : vector<4x8x8xf32> to vector<4x8x8xbf16>
    %c0_52 = arith.constant 0 : index
    %c0_53 = arith.constant 0 : index
    %c0_54 = arith.constant 0 : index
    %c0_55 = arith.constant 0 : index
    %83 = vector.load %arg13[%c0_52, %c0_53, %c0_54, %c0_55] : memref<2x4x8x32xbf16, #tpu.memory_space<vmem>>, vector<1x4x8x32xbf16>
    %84 = vector.shape_cast %83 : vector<1x4x8x32xbf16> to vector<4x8x32xbf16>
    "tpu.trace_start"() <{level = 10 : i32, message = "hsd,hdo->hso"}> : () -> ()
    %cst_56 = arith.constant dense<0.000000e+00> : vector<4x8x32xf32>
    %85 = tpu.matmul %82, %84, %cst_56 {dimension_numbers = #tpu.dot_dimension_numbers<[2], [1], [1], [2], [0, 0, 0, 1, 1, 2], [0], [0]>} : vector<4x8x8xbf16>, vector<4x8x32xbf16>, vector<4x8x32xf32> -> vector<4x8x32xf32>
    "tpu.trace_stop"() : () -> ()
    %cst_57 = arith.constant dense<0.000000e+00> : vector<8x32xf32>
    %86 = vector.multi_reduction <add>, %85, %cst_57 [0] : vector<4x8x32xf32> to vector<8x32xf32>
    %c0_58 = arith.constant 0 : index
    %c0_59 = arith.constant 0 : index
    %c0_60 = arith.constant 0 : index
    %87 = vector.load %arg14[%c0_58, %c0_59, %c0_60] : memref<2x1x32xf32, #tpu.memory_space<vmem>>, vector<1x1x32xf32>
    %88 = vector.shape_cast %87 : vector<1x1x32xf32> to vector<1x32xf32>
    %89 = vector.broadcast %88 : vector<1x32xf32> to vector<8x32xf32>
    %90 = arith.addf %86, %89 : vector<8x32xf32>
    %91 = arith.addf %90, %33 : vector<8x32xf32>
    %c0_61 = arith.constant 0 : index
    %c0_62 = arith.constant 0 : index
    %c0_63 = arith.constant 0 : index
    %92 = vector.load %arg15[%c0_61, %c0_62, %c0_63] : memref<2x1x32xf32, #tpu.memory_space<vmem>>, vector<1x1x32xf32>
    %93 = vector.shape_cast %92 : vector<1x1x32xf32> to vector<1x32xf32>
    %c0_64 = arith.constant 0 : index
    %c0_65 = arith.constant 0 : index
    %c0_66 = arith.constant 0 : index
    %94 = vector.load %arg16[%c0_64, %c0_65, %c0_66] : memref<2x1x32xf32, #tpu.memory_space<vmem>>, vector<1x1x32xf32>
    %95 = vector.shape_cast %94 : vector<1x1x32xf32> to vector<1x32xf32>
    %cst_67 = arith.constant dense<0.000000e+00> : vector<8xf32>
    %96 = vector.multi_reduction <add>, %91, %cst_67 [1] : vector<8x32xf32> to vector<8xf32>
    %97 = vector.shape_cast %96 : vector<8xf32> to vector<8x1xf32>
    %cst_68 = arith.constant 3.200000e+01 : f32
    %98 = vector.broadcast %cst_68 : f32 to vector<8x1xf32>
    %99 = arith.divf %97, %98 : vector<8x1xf32>
    %100 = vector.broadcast %99 : vector<8x1xf32> to vector<8x32xf32>
    %101 = arith.subf %91, %100 : vector<8x32xf32>
    %102 = arith.mulf %101, %101 : vector<8x32xf32>
    %cst_69 = arith.constant dense<0.000000e+00> : vector<8xf32>
    %103 = vector.multi_reduction <add>, %102, %cst_69 [1] : vector<8x32xf32> to vector<8xf32>
    %104 = vector.shape_cast %103 : vector<8xf32> to vector<8x1xf32>
    %cst_70 = arith.constant 3.200000e+01 : f32
    %105 = vector.broadcast %cst_70 : f32 to vector<8x1xf32>
    %106 = arith.divf %104, %105 : vector<8x1xf32>
    %cst_71 = arith.constant 9.99999996E-13 : f32
    %107 = vector.broadcast %cst_71 : f32 to vector<8x1xf32>
    %108 = arith.addf %106, %107 : vector<8x1xf32>
    %109 = math.rsqrt %108 : vector<8x1xf32>
    %110 = vector.broadcast %109 : vector<8x1xf32> to vector<8x32xf32>
    %111 = arith.mulf %101, %110 : vector<8x32xf32>
    %112 = vector.broadcast %93 : vector<1x32xf32> to vector<8x32xf32>
    %113 = arith.mulf %111, %112 : vector<8x32xf32>
    %114 = vector.broadcast %95 : vector<1x32xf32> to vector<8x32xf32>
    %115 = arith.addf %113, %114 : vector<8x32xf32>
    %116 = arith.truncf %115 : vector<8x32xf32> to vector<8x32xbf16>
    %c0_72 = arith.constant 0 : index
    %c0_73 = arith.constant 0 : index
    %c0_74 = arith.constant 0 : index
    %117 = vector.load %arg17[%c0_72, %c0_73, %c0_74] : memref<2x32x64xbf16, #tpu.memory_space<vmem>>, vector<1x32x64xbf16>
    %118 = vector.shape_cast %117 : vector<1x32x64xbf16> to vector<32x64xbf16>
    %cst_75 = arith.constant dense<0.000000e+00> : vector<8x64xf32>
    %119 = tpu.matmul %116, %118, %cst_75 {dimension_numbers = #tpu.dot_dimension_numbers<[1], [0], [0], [1], [0, 0, 1, 1], [], []>} : vector<8x32xbf16>, vector<32x64xbf16>, vector<8x64xf32> -> vector<8x64xf32>
    %c0_76 = arith.constant 0 : index
    %c0_77 = arith.constant 0 : index
    %c0_78 = arith.constant 0 : index
    %120 = vector.load %arg18[%c0_76, %c0_77, %c0_78] : memref<2x1x64xf32, #tpu.memory_space<vmem>>, vector<1x1x64xf32>
    %121 = vector.shape_cast %120 : vector<1x1x64xf32> to vector<1x64xf32>
    %122 = vector.broadcast %121 : vector<1x64xf32> to vector<8x64xf32>
    %123 = arith.addf %119, %122 : vector<8x64xf32>
    %cst_79 = arith.constant 5.000000e-01 : f32
    %124 = vector.broadcast %cst_79 : f32 to vector<8x64xf32>
    %125 = arith.mulf %124, %123 : vector<8x64xf32>
    %cst_80 = arith.constant 4.471500e-02 : f32
    %126 = vector.broadcast %cst_80 : f32 to vector<8x64xf32>
    %127 = arith.mulf %126, %123 : vector<8x64xf32>
    %128 = arith.mulf %127, %123 : vector<8x64xf32>
    %129 = arith.mulf %128, %123 : vector<8x64xf32>
    %130 = arith.addf %123, %129 : vector<8x64xf32>
    %cst_81 = arith.constant 0.797884583 : f32
    %131 = vector.broadcast %cst_81 : f32 to vector<8x64xf32>
    %132 = arith.mulf %131, %130 : vector<8x64xf32>
    %133 = math.tanh %132 : vector<8x64xf32>
    %cst_82 = arith.constant 1.000000e+00 : f32
    %134 = vector.broadcast %cst_82 : f32 to vector<8x64xf32>
    %135 = arith.addf %134, %133 : vector<8x64xf32>
    %136 = arith.mulf %125, %135 : vector<8x64xf32>
    %137 = arith.truncf %136 : vector<8x64xf32> to vector<8x64xbf16>
    %c0_83 = arith.constant 0 : index
    %c0_84 = arith.constant 0 : index
    %c0_85 = arith.constant 0 : index
    %138 = vector.load %arg19[%c0_83, %c0_84, %c0_85] : memref<2x64x32xbf16, #tpu.memory_space<vmem>>, vector<1x64x32xbf16>
    %139 = vector.shape_cast %138 : vector<1x64x32xbf16> to vector<64x32xbf16>
    %cst_86 = arith.constant dense<0.000000e+00> : vector<8x32xf32>
    %140 = tpu.matmul %137, %139, %cst_86 {dimension_numbers = #tpu.dot_dimension_numbers<[1], [0], [0], [1], [0, 0, 1, 1], [], []>} : vector<8x64xbf16>, vector<64x32xbf16>, vector<8x32xf32> -> vector<8x32xf32>
    %c0_87 = arith.constant 0 : index
    %c0_88 = arith.constant 0 : index
    %c0_89 = arith.constant 0 : index
    %141 = vector.load %arg20[%c0_87, %c0_88, %c0_89] : memref<2x1x32xf32, #tpu.memory_space<vmem>>, vector<1x1x32xf32>
    %142 = vector.shape_cast %141 : vector<1x1x32xf32> to vector<1x32xf32>
    %143 = vector.broadcast %142 : vector<1x32xf32> to vector<8x32xf32>
    %144 = arith.addf %140, %143 : vector<8x32xf32>
    %145 = arith.addf %144, %115 : vector<8x32xf32>
    %c0_90 = arith.constant 0 : index
    %c0_91 = arith.constant 0 : index
    %c0_92 = arith.constant 0 : index
    %146 = vector.load %arg21[%c0_90, %c0_91, %c0_92] : memref<2x1x32xf32, #tpu.memory_space<vmem>>, vector<1x1x32xf32>
    %147 = vector.shape_cast %146 : vector<1x1x32xf32> to vector<1x32xf32>
    %c0_93 = arith.constant 0 : index
    %c0_94 = arith.constant 0 : index
    %c0_95 = arith.constant 0 : index
    %148 = vector.load %arg22[%c0_93, %c0_94, %c0_95] : memref<2x1x32xf32, #tpu.memory_space<vmem>>, vector<1x1x32xf32>
    %149 = vector.shape_cast %148 : vector<1x1x32xf32> to vector<1x32xf32>
    %cst_96 = arith.constant dense<0.000000e+00> : vector<8xf32>
    %150 = vector.multi_reduction <add>, %145, %cst_96 [1] : vector<8x32xf32> to vector<8xf32>
    %151 = vector.shape_cast %150 : vector<8xf32> to vector<8x1xf32>
    %cst_97 = arith.constant 3.200000e+01 : f32
    %152 = vector.broadcast %cst_97 : f32 to vector<8x1xf32>
    %153 = arith.divf %151, %152 : vector<8x1xf32>
    %154 = vector.broadcast %153 : vector<8x1xf32> to vector<8x32xf32>
    %155 = arith.subf %145, %154 : vector<8x32xf32>
    %156 = arith.mulf %155, %155 : vector<8x32xf32>
    %cst_98 = arith.constant dense<0.000000e+00> : vector<8xf32>
    %157 = vector.multi_reduction <add>, %156, %cst_98 [1] : vector<8x32xf32> to vector<8xf32>
    %158 = vector.shape_cast %157 : vector<8xf32> to vector<8x1xf32>
    %cst_99 = arith.constant 3.200000e+01 : f32
    %159 = vector.broadcast %cst_99 : f32 to vector<8x1xf32>
    %160 = arith.divf %158, %159 : vector<8x1xf32>
    %cst_100 = arith.constant 9.99999996E-13 : f32
    %161 = vector.broadcast %cst_100 : f32 to vector<8x1xf32>
    %162 = arith.addf %160, %161 : vector<8x1xf32>
    %163 = math.rsqrt %162 : vector<8x1xf32>
    %164 = vector.broadcast %163 : vector<8x1xf32> to vector<8x32xf32>
    %165 = arith.mulf %155, %164 : vector<8x32xf32>
    %166 = vector.broadcast %147 : vector<1x32xf32> to vector<8x32xf32>
    %167 = arith.mulf %165, %166 : vector<8x32xf32>
    %168 = vector.broadcast %149 : vector<1x32xf32> to vector<8x32xf32>
    %169 = arith.addf %167, %168 : vector<8x32xf32>
    %170 = arith.truncf %169 : vector<8x32xf32> to vector<8x32xbf16>
    %171 = vector.shape_cast %170 : vector<8x32xbf16> to vector<1x8x32xbf16>
    %172 = vector.shape_cast %171 : vector<1x8x32xbf16> to vector<1x8x32xbf16>
    %173 = vector.broadcast %172 : vector<1x8x32xbf16> to vector<4x8x32xbf16>
    %c1 = arith.constant 1 : index
    %c0_101 = arith.constant 0 : index
    %c0_102 = arith.constant 0 : index
    %c0_103 = arith.constant 0 : index
    %174 = vector.load %arg7[%c1, %c0_101, %c0_102, %c0_103] : memref<2x4x32x8xbf16, #tpu.memory_space<vmem>>, vector<1x4x32x8xbf16>
    %175 = vector.shape_cast %174 : vector<1x4x32x8xbf16> to vector<4x32x8xbf16>
    "tpu.trace_start"() <{level = 10 : i32, message = "hsd,hdk->hsk"}> : () -> ()
    %cst_104 = arith.constant dense<0.000000e+00> : vector<4x8x8xf32>
    %176 = tpu.matmul %173, %175, %cst_104 {dimension_numbers = #tpu.dot_dimension_numbers<[2], [1], [1], [2], [0, 0, 0, 1, 1, 2], [0], [0]>} : vector<4x8x32xbf16>, vector<4x32x8xbf16>, vector<4x8x8xf32> -> vector<4x8x8xf32>
    "tpu.trace_stop"() : () -> ()
    %c1_105 = arith.constant 1 : index
    %c0_106 = arith.constant 0 : index
    %c0_107 = arith.constant 0 : index
    %c0_108 = arith.constant 0 : index
    %177 = vector.load %arg10[%c1_105, %c0_106, %c0_107, %c0_108] : memref<2x4x1x8xf32, #tpu.memory_space<vmem>>, vector<1x4x1x8xf32>
    %178 = vector.shape_cast %177 : vector<1x4x1x8xf32> to vector<4x1x8xf32>
    %179 = vector.broadcast %178 : vector<4x1x8xf32> to vector<4x8x8xf32>
    %180 = arith.addf %176, %179 : vector<4x8x8xf32>
    %c1_109 = arith.constant 1 : index
    %c0_110 = arith.constant 0 : index
    %c0_111 = arith.constant 0 : index
    %c0_112 = arith.constant 0 : index
    %181 = vector.load %arg8[%c1_109, %c0_110, %c0_111, %c0_112] : memref<2x4x32x8xbf16, #tpu.memory_space<vmem>>, vector<1x4x32x8xbf16>
    %182 = vector.shape_cast %181 : vector<1x4x32x8xbf16> to vector<4x32x8xbf16>
    "tpu.trace_start"() <{level = 10 : i32, message = "hsd,hdk->hsk"}> : () -> ()
    %cst_113 = arith.constant dense<0.000000e+00> : vector<4x8x8xf32>
    %183 = tpu.matmul %173, %182, %cst_113 {dimension_numbers = #tpu.dot_dimension_numbers<[2], [1], [1], [2], [0, 0, 0, 1, 1, 2], [0], [0]>} : vector<4x8x32xbf16>, vector<4x32x8xbf16>, vector<4x8x8xf32> -> vector<4x8x8xf32>
    "tpu.trace_stop"() : () -> ()
    %c1_114 = arith.constant 1 : index
    %c0_115 = arith.constant 0 : index
    %c0_116 = arith.constant 0 : index
    %c0_117 = arith.constant 0 : index
    %184 = vector.load %arg11[%c1_114, %c0_115, %c0_116, %c0_117] : memref<2x4x1x8xf32, #tpu.memory_space<vmem>>, vector<1x4x1x8xf32>
    %185 = vector.shape_cast %184 : vector<1x4x1x8xf32> to vector<4x1x8xf32>
    %186 = vector.broadcast %185 : vector<4x1x8xf32> to vector<4x8x8xf32>
    %187 = arith.addf %183, %186 : vector<4x8x8xf32>
    %c1_118 = arith.constant 1 : index
    %c0_119 = arith.constant 0 : index
    %c0_120 = arith.constant 0 : index
    %c0_121 = arith.constant 0 : index
    %188 = vector.load %arg9[%c1_118, %c0_119, %c0_120, %c0_121] : memref<2x4x32x8xbf16, #tpu.memory_space<vmem>>, vector<1x4x32x8xbf16>
    %189 = vector.shape_cast %188 : vector<1x4x32x8xbf16> to vector<4x32x8xbf16>
    "tpu.trace_start"() <{level = 10 : i32, message = "hsd,hdk->hsk"}> : () -> ()
    %cst_122 = arith.constant dense<0.000000e+00> : vector<4x8x8xf32>
    %190 = tpu.matmul %173, %189, %cst_122 {dimension_numbers = #tpu.dot_dimension_numbers<[2], [1], [1], [2], [0, 0, 0, 1, 1, 2], [0], [0]>} : vector<4x8x32xbf16>, vector<4x32x8xbf16>, vector<4x8x8xf32> -> vector<4x8x8xf32>
    "tpu.trace_stop"() : () -> ()
    %c1_123 = arith.constant 1 : index
    %c0_124 = arith.constant 0 : index
    %c0_125 = arith.constant 0 : index
    %c0_126 = arith.constant 0 : index
    %191 = vector.load %arg12[%c1_123, %c0_124, %c0_125, %c0_126] : memref<2x4x1x8xf32, #tpu.memory_space<vmem>>, vector<1x4x1x8xf32>
    %192 = vector.shape_cast %191 : vector<1x4x1x8xf32> to vector<4x1x8xf32>
    %193 = vector.broadcast %192 : vector<4x1x8xf32> to vector<4x8x8xf32>
    %194 = arith.addf %190, %193 : vector<4x8x8xf32>
    "tpu.trace_start"() <{level = 10 : i32, message = "hqd,hkd->hqk"}> : () -> ()
    %cst_127 = arith.constant dense<0.000000e+00> : vector<4x8x8xf32>
    %195 = tpu.matmul %180, %187, %cst_127 {dimension_numbers = #tpu.dot_dimension_numbers<[2], [2], [1], [1], [0, 0, 0, 1, 1, 1], [0], [0]>} : vector<4x8x8xf32>, vector<4x8x8xf32>, vector<4x8x8xf32> -> vector<4x8x8xf32>
    "tpu.trace_stop"() : () -> ()
    %cst_128 = arith.constant 0.353553385 : f32
    %196 = vector.broadcast %cst_128 : f32 to vector<4x8x8xf32>
    %197 = arith.mulf %195, %196 : vector<4x8x8xf32>
    %198 = vector.shape_cast %39 : vector<1x8xf32> to vector<1x1x8xf32>
    %199 = vector.broadcast %198 : vector<1x1x8xf32> to vector<4x8x8xf32>
    %200 = arith.addf %197, %199 : vector<4x8x8xf32>
    %cst_129 = arith.constant dense<0xFF800000> : vector<4x8xf32>
    %201 = vector.multi_reduction <maximumf>, %200, %cst_129 [2] : vector<4x8x8xf32> to vector<4x8xf32>
    %202 = vector.shape_cast %201 : vector<4x8xf32> to vector<4x8x1xf32>
    %203 = vector.broadcast %202 : vector<4x8x1xf32> to vector<4x8x8xf32>
    %204 = arith.subf %200, %203 : vector<4x8x8xf32>
    %205 = math.exp %204 : vector<4x8x8xf32>
    %cst_130 = arith.constant dense<0.000000e+00> : vector<4x8xf32>
    %206 = vector.multi_reduction <add>, %205, %cst_130 [2] : vector<4x8x8xf32> to vector<4x8xf32>
    %207 = vector.shape_cast %206 : vector<4x8xf32> to vector<4x8x1xf32>
    %208 = tpu.reciprocal %207 {approx = true} : vector<4x8x1xf32> -> vector<4x8x1xf32>
    %209 = vector.broadcast %208 : vector<4x8x1xf32> to vector<4x8x8xf32>
    %210 = arith.mulf %205, %209 : vector<4x8x8xf32>
    "tpu.trace_start"() <{level = 10 : i32, message = "hqk,hkd->hqd"}> : () -> ()
    %cst_131 = arith.constant dense<0.000000e+00> : vector<4x8x8xf32>
    %211 = tpu.matmul %210, %194, %cst_131 {dimension_numbers = #tpu.dot_dimension_numbers<[2], [1], [1], [2], [0, 0, 0, 1, 1, 2], [0], [0]>} : vector<4x8x8xf32>, vector<4x8x8xf32>, vector<4x8x8xf32> -> vector<4x8x8xf32>
    "tpu.trace_stop"() : () -> ()
    %212 = arith.truncf %211 : vector<4x8x8xf32> to vector<4x8x8xbf16>
    %c1_132 = arith.constant 1 : index
    %c0_133 = arith.constant 0 : index
    %c0_134 = arith.constant 0 : index
    %c0_135 = arith.constant 0 : index
    %213 = vector.load %arg13[%c1_132, %c0_133, %c0_134, %c0_135] : memref<2x4x8x32xbf16, #tpu.memory_space<vmem>>, vector<1x4x8x32xbf16>
    %214 = vector.shape_cast %213 : vector<1x4x8x32xbf16> to vector<4x8x32xbf16>
    "tpu.trace_start"() <{level = 10 : i32, message = "hsd,hdo->hso"}> : () -> ()
    %cst_136 = arith.constant dense<0.000000e+00> : vector<4x8x32xf32>
    %215 = tpu.matmul %212, %214, %cst_136 {dimension_numbers = #tpu.dot_dimension_numbers<[2], [1], [1], [2], [0, 0, 0, 1, 1, 2], [0], [0]>} : vector<4x8x8xbf16>, vector<4x8x32xbf16>, vector<4x8x32xf32> -> vector<4x8x32xf32>
    "tpu.trace_stop"() : () -> ()
    %cst_137 = arith.constant dense<0.000000e+00> : vector<8x32xf32>
    %216 = vector.multi_reduction <add>, %215, %cst_137 [0] : vector<4x8x32xf32> to vector<8x32xf32>
    %c1_138 = arith.constant 1 : index
    %c0_139 = arith.constant 0 : index
    %c0_140 = arith.constant 0 : index
    %217 = vector.load %arg14[%c1_138, %c0_139, %c0_140] : memref<2x1x32xf32, #tpu.memory_space<vmem>>, vector<1x1x32xf32>
    %218 = vector.shape_cast %217 : vector<1x1x32xf32> to vector<1x32xf32>
    %219 = vector.broadcast %218 : vector<1x32xf32> to vector<8x32xf32>
    %220 = arith.addf %216, %219 : vector<8x32xf32>
    %221 = arith.addf %220, %169 : vector<8x32xf32>
    %c1_141 = arith.constant 1 : index
    %c0_142 = arith.constant 0 : index
    %c0_143 = arith.constant 0 : index
    %222 = vector.load %arg15[%c1_141, %c0_142, %c0_143] : memref<2x1x32xf32, #tpu.memory_space<vmem>>, vector<1x1x32xf32>
    %223 = vector.shape_cast %222 : vector<1x1x32xf32> to vector<1x32xf32>
    %c1_144 = arith.constant 1 : index
    %c0_145 = arith.constant 0 : index
    %c0_146 = arith.constant 0 : index
    %224 = vector.load %arg16[%c1_144, %c0_145, %c0_146] : memref<2x1x32xf32, #tpu.memory_space<vmem>>, vector<1x1x32xf32>
    %225 = vector.shape_cast %224 : vector<1x1x32xf32> to vector<1x32xf32>
    %cst_147 = arith.constant dense<0.000000e+00> : vector<8xf32>
    %226 = vector.multi_reduction <add>, %221, %cst_147 [1] : vector<8x32xf32> to vector<8xf32>
    %227 = vector.shape_cast %226 : vector<8xf32> to vector<8x1xf32>
    %cst_148 = arith.constant 3.200000e+01 : f32
    %228 = vector.broadcast %cst_148 : f32 to vector<8x1xf32>
    %229 = arith.divf %227, %228 : vector<8x1xf32>
    %230 = vector.broadcast %229 : vector<8x1xf32> to vector<8x32xf32>
    %231 = arith.subf %221, %230 : vector<8x32xf32>
    %232 = arith.mulf %231, %231 : vector<8x32xf32>
    %cst_149 = arith.constant dense<0.000000e+00> : vector<8xf32>
    %233 = vector.multi_reduction <add>, %232, %cst_149 [1] : vector<8x32xf32> to vector<8xf32>
    %234 = vector.shape_cast %233 : vector<8xf32> to vector<8x1xf32>
    %cst_150 = arith.constant 3.200000e+01 : f32
    %235 = vector.broadcast %cst_150 : f32 to vector<8x1xf32>
    %236 = arith.divf %234, %235 : vector<8x1xf32>
    %cst_151 = arith.constant 9.99999996E-13 : f32
    %237 = vector.broadcast %cst_151 : f32 to vector<8x1xf32>
    %238 = arith.addf %236, %237 : vector<8x1xf32>
    %239 = math.rsqrt %238 : vector<8x1xf32>
    %240 = vector.broadcast %239 : vector<8x1xf32> to vector<8x32xf32>
    %241 = arith.mulf %231, %240 : vector<8x32xf32>
    %242 = vector.broadcast %223 : vector<1x32xf32> to vector<8x32xf32>
    %243 = arith.mulf %241, %242 : vector<8x32xf32>
    %244 = vector.broadcast %225 : vector<1x32xf32> to vector<8x32xf32>
    %245 = arith.addf %243, %244 : vector<8x32xf32>
    %246 = arith.truncf %245 : vector<8x32xf32> to vector<8x32xbf16>
    %c1_152 = arith.constant 1 : index
    %c0_153 = arith.constant 0 : index
    %c0_154 = arith.constant 0 : index
    %247 = vector.load %arg17[%c1_152, %c0_153, %c0_154] : memref<2x32x64xbf16, #tpu.memory_space<vmem>>, vector<1x32x64xbf16>
    %248 = vector.shape_cast %247 : vector<1x32x64xbf16> to vector<32x64xbf16>
    %cst_155 = arith.constant dense<0.000000e+00> : vector<8x64xf32>
    %249 = tpu.matmul %246, %248, %cst_155 {dimension_numbers = #tpu.dot_dimension_numbers<[1], [0], [0], [1], [0, 0, 1, 1], [], []>} : vector<8x32xbf16>, vector<32x64xbf16>, vector<8x64xf32> -> vector<8x64xf32>
    %c1_156 = arith.constant 1 : index
    %c0_157 = arith.constant 0 : index
    %c0_158 = arith.constant 0 : index
    %250 = vector.load %arg18[%c1_156, %c0_157, %c0_158] : memref<2x1x64xf32, #tpu.memory_space<vmem>>, vector<1x1x64xf32>
    %251 = vector.shape_cast %250 : vector<1x1x64xf32> to vector<1x64xf32>
    %252 = vector.broadcast %251 : vector<1x64xf32> to vector<8x64xf32>
    %253 = arith.addf %249, %252 : vector<8x64xf32>
    %cst_159 = arith.constant 5.000000e-01 : f32
    %254 = vector.broadcast %cst_159 : f32 to vector<8x64xf32>
    %255 = arith.mulf %254, %253 : vector<8x64xf32>
    %cst_160 = arith.constant 4.471500e-02 : f32
    %256 = vector.broadcast %cst_160 : f32 to vector<8x64xf32>
    %257 = arith.mulf %256, %253 : vector<8x64xf32>
    %258 = arith.mulf %257, %253 : vector<8x64xf32>
    %259 = arith.mulf %258, %253 : vector<8x64xf32>
    %260 = arith.addf %253, %259 : vector<8x64xf32>
    %cst_161 = arith.constant 0.797884583 : f32
    %261 = vector.broadcast %cst_161 : f32 to vector<8x64xf32>
    %262 = arith.mulf %261, %260 : vector<8x64xf32>
    %263 = math.tanh %262 : vector<8x64xf32>
    %cst_162 = arith.constant 1.000000e+00 : f32
    %264 = vector.broadcast %cst_162 : f32 to vector<8x64xf32>
    %265 = arith.addf %264, %263 : vector<8x64xf32>
    %266 = arith.mulf %255, %265 : vector<8x64xf32>
    %267 = arith.truncf %266 : vector<8x64xf32> to vector<8x64xbf16>
    %c1_163 = arith.constant 1 : index
    %c0_164 = arith.constant 0 : index
    %c0_165 = arith.constant 0 : index
    %268 = vector.load %arg19[%c1_163, %c0_164, %c0_165] : memref<2x64x32xbf16, #tpu.memory_space<vmem>>, vector<1x64x32xbf16>
    %269 = vector.shape_cast %268 : vector<1x64x32xbf16> to vector<64x32xbf16>
    %cst_166 = arith.constant dense<0.000000e+00> : vector<8x32xf32>
    %270 = tpu.matmul %267, %269, %cst_166 {dimension_numbers = #tpu.dot_dimension_numbers<[1], [0], [0], [1], [0, 0, 1, 1], [], []>} : vector<8x64xbf16>, vector<64x32xbf16>, vector<8x32xf32> -> vector<8x32xf32>
    %c1_167 = arith.constant 1 : index
    %c0_168 = arith.constant 0 : index
    %c0_169 = arith.constant 0 : index
    %271 = vector.load %arg20[%c1_167, %c0_168, %c0_169] : memref<2x1x32xf32, #tpu.memory_space<vmem>>, vector<1x1x32xf32>
    %272 = vector.shape_cast %271 : vector<1x1x32xf32> to vector<1x32xf32>
    %273 = vector.broadcast %272 : vector<1x32xf32> to vector<8x32xf32>
    %274 = arith.addf %270, %273 : vector<8x32xf32>
    %275 = arith.addf %274, %245 : vector<8x32xf32>
    %c1_170 = arith.constant 1 : index
    %c0_171 = arith.constant 0 : index
    %c0_172 = arith.constant 0 : index
    %276 = vector.load %arg21[%c1_170, %c0_171, %c0_172] : memref<2x1x32xf32, #tpu.memory_space<vmem>>, vector<1x1x32xf32>
    %277 = vector.shape_cast %276 : vector<1x1x32xf32> to vector<1x32xf32>
    %c1_173 = arith.constant 1 : index
    %c0_174 = arith.constant 0 : index
    %c0_175 = arith.constant 0 : index
    %278 = vector.load %arg22[%c1_173, %c0_174, %c0_175] : memref<2x1x32xf32, #tpu.memory_space<vmem>>, vector<1x1x32xf32>
    %279 = vector.shape_cast %278 : vector<1x1x32xf32> to vector<1x32xf32>
    %cst_176 = arith.constant dense<0.000000e+00> : vector<8xf32>
    %280 = vector.multi_reduction <add>, %275, %cst_176 [1] : vector<8x32xf32> to vector<8xf32>
    %281 = vector.shape_cast %280 : vector<8xf32> to vector<8x1xf32>
    %cst_177 = arith.constant 3.200000e+01 : f32
    %282 = vector.broadcast %cst_177 : f32 to vector<8x1xf32>
    %283 = arith.divf %281, %282 : vector<8x1xf32>
    %284 = vector.broadcast %283 : vector<8x1xf32> to vector<8x32xf32>
    %285 = arith.subf %275, %284 : vector<8x32xf32>
    %286 = arith.mulf %285, %285 : vector<8x32xf32>
    %cst_178 = arith.constant dense<0.000000e+00> : vector<8xf32>
    %287 = vector.multi_reduction <add>, %286, %cst_178 [1] : vector<8x32xf32> to vector<8xf32>
    %288 = vector.shape_cast %287 : vector<8xf32> to vector<8x1xf32>
    %cst_179 = arith.constant 3.200000e+01 : f32
    %289 = vector.broadcast %cst_179 : f32 to vector<8x1xf32>
    %290 = arith.divf %288, %289 : vector<8x1xf32>
    %cst_180 = arith.constant 9.99999996E-13 : f32
    %291 = vector.broadcast %cst_180 : f32 to vector<8x1xf32>
    %292 = arith.addf %290, %291 : vector<8x1xf32>
    %293 = math.rsqrt %292 : vector<8x1xf32>
    %294 = vector.broadcast %293 : vector<8x1xf32> to vector<8x32xf32>
    %295 = arith.mulf %285, %294 : vector<8x32xf32>
    %296 = vector.broadcast %277 : vector<1x32xf32> to vector<8x32xf32>
    %297 = arith.mulf %295, %296 : vector<8x32xf32>
    %298 = vector.broadcast %279 : vector<1x32xf32> to vector<8x32xf32>
    %299 = arith.addf %297, %298 : vector<8x32xf32>
    %c0_181 = arith.constant 0 : index
    %c0_182 = arith.constant 0 : index
    %c0_183 = arith.constant 0 : index
    %300 = vector.load %arg23[%c0_181, %c0_182, %c0_183] : memref<1x8x32xf32, #tpu.memory_space<vmem>>, vector<1x8x32xf32>
    %301 = vector.shape_cast %300 : vector<1x8x32xf32> to vector<8x32xf32>
    %302 = vector.shape_cast %299 : vector<8x32xf32> to vector<1x8x32xf32>
    tpu.vector_store %arg23[%c0_181, %c0_182, %c0_183], %302 {strides = array<i32>} : memref<1x8x32xf32, #tpu.memory_space<vmem>>, vector<1x8x32xf32>,
    return
  }
  func.func @transform_0(%arg0: i32) -> (i32, i32, i32) {
    %c0_i32 = arith.constant 0 : i32
    %c0_i32_0 = arith.constant 0 : i32
    %c0_i32_1 = arith.constant 0 : i32
    return %arg0, %c0_i32, %c0_i32_0 : i32, i32, i32
  }
  func.func @transform_1(%arg0: i32) -> (i32, i32, i32) {
    %c0_i32 = arith.constant 0 : i32
    %c0_i32_0 = arith.constant 0 : i32
    %c0_i32_1 = arith.constant 0 : i32
    return %arg0, %c0_i32, %c0_i32_0 : i32, i32, i32
  }
  func.func @transform_2(%arg0: i32) -> (i32, i32) {
    %c0_i32 = arith.constant 0 : i32
    %c0_i32_0 = arith.constant 0 : i32
    %c0_i32_1 = arith.constant 0 : i32
    return %c0_i32, %c0_i32_0 : i32, i32
  }
  func.func @transform_3(%arg0: i32) -> (i32, i32) {
    %c0_i32 = arith.constant 0 : i32
    %c0_i32_0 = arith.constant 0 : i32
    %c0_i32_1 = arith.constant 0 : i32
    return %c0_i32, %c0_i32_0 : i32, i32
  }
  func.func @transform_4(%arg0: i32) -> (i32, i32) {
    %c0_i32 = arith.constant 0 : i32
    %c0_i32_0 = arith.constant 0 : i32
    %c0_i32_1 = arith.constant 0 : i32
    return %c0_i32, %c0_i32_0 : i32, i32
  }
  func.func @transform_5(%arg0: i32) -> (i32, i32) {
    %c0_i32 = arith.constant 0 : i32
    %c0_i32_0 = arith.constant 0 : i32
    %c0_i32_1 = arith.constant 0 : i32
    return %c0_i32, %c0_i32_0 : i32, i32
  }
  func.func @transform_6(%arg0: i32) -> (i32, i32, i32, i32) {
    %c0_i32 = arith.constant 0 : i32
    %c0_i32_0 = arith.constant 0 : i32
    %c0_i32_1 = arith.constant 0 : i32
    %c0_i32_2 = arith.constant 0 : i32
    %c0_i32_3 = arith.constant 0 : i32
    return %c0_i32, %c0_i32_0, %c0_i32_1, %c0_i32_2 : i32, i32, i32, i32
  }
  func.func @transform_7(%arg0: i32) -> (i32, i32, i32, i32) {
    %c0_i32 = arith.constant 0 : i32
    %c0_i32_0 = arith.constant 0 : i32
    %c0_i32_1 = arith.constant 0 : i32
    %c0_i32_2 = arith.constant 0 : i32
    %c0_i32_3 = arith.constant 0 : i32
    return %c0_i32, %c0_i32_0, %c0_i32_1, %c0_i32_2 : i32, i32, i32, i32
  }
  func.func @transform_8(%arg0: i32) -> (i32, i32, i32, i32) {
    %c0_i32 = arith.constant 0 : i32
    %c0_i32_0 = arith.constant 0 : i32
    %c0_i32_1 = arith.constant 0 : i32
    %c0_i32_2 = arith.constant 0 : i32
    %c0_i32_3 = arith.constant 0 : i32
    return %c0_i32, %c0_i32_0, %c0_i32_1, %c0_i32_2 : i32, i32, i32, i32
  }
  func.func @transform_9(%arg0: i32) -> (i32, i32, i32, i32) {
    %c0_i32 = arith.constant 0 : i32
    %c0_i32_0 = arith.constant 0 : i32
    %c0_i32_1 = arith.constant 0 : i32
    %c0_i32_2 = arith.constant 0 : i32
    %c0_i32_3 = arith.constant 0 : i32
    return %c0_i32, %c0_i32_0, %c0_i32_1, %c0_i32_2 : i32, i32, i32, i32
  }
  func.func @transform_10(%arg0: i32) -> (i32, i32, i32, i32) {
    %c0_i32 = arith.constant 0 : i32
    %c0_i32_0 = arith.constant 0 : i32
    %c0_i32_1 = arith.constant 0 : i32
    %c0_i32_2 = arith.constant 0 : i32
    %c0_i32_3 = arith.constant 0 : i32
    return %c0_i32, %c0_i32_0, %c0_i32_1, %c0_i32_2 : i32, i32, i32, i32
  }
  func.func @transform_11(%arg0: i32) -> (i32, i32, i32, i32) {
    %c0_i32 = arith.constant 0 : i32
    %c0_i32_0 = arith.constant 0 : i32
    %c0_i32_1 = arith.constant 0 : i32
    %c0_i32_2 = arith.constant 0 : i32
    %c0_i32_3 = arith.constant 0 : i32
    return %c0_i32, %c0_i32_0, %c0_i32_1, %c0_i32_2 : i32, i32, i32, i32
  }
  func.func @transform_12(%arg0: i32) -> (i32, i32, i32, i32) {
    %c0_i32 = arith.constant 0 : i32
    %c0_i32_0 = arith.constant 0 : i32
    %c0_i32_1 = arith.constant 0 : i32
    %c0_i32_2 = arith.constant 0 : i32
    %c0_i32_3 = arith.constant 0 : i32
    return %c0_i32, %c0_i32_0, %c0_i32_1, %c0_i32_2 : i32, i32, i32, i32
  }
  func.func @transform_13(%arg0: i32) -> (i32, i32, i32) {
    %c0_i32 = arith.constant 0 : i32
    %c0_i32_0 = arith.constant 0 : i32
    %c0_i32_1 = arith.constant 0 : i32
    %c0_i32_2 = arith.constant 0 : i32
    return %c0_i32, %c0_i32_0, %c0_i32_1 : i32, i32, i32
  }
  func.func @transform_14(%arg0: i32) -> (i32, i32, i32) {
    %c0_i32 = arith.constant 0 : i32
    %c0_i32_0 = arith.constant 0 : i32
    %c0_i32_1 = arith.constant 0 : i32
    %c0_i32_2 = arith.constant 0 : i32
    return %c0_i32, %c0_i32_0, %c0_i32_1 : i32, i32, i32
  }
  func.func @transform_15(%arg0: i32) -> (i32, i32, i32) {
    %c0_i32 = arith.constant 0 : i32
    %c0_i32_0 = arith.constant 0 : i32
    %c0_i32_1 = arith.constant 0 : i32
    %c0_i32_2 = arith.constant 0 : i32
    return %c0_i32, %c0_i32_0, %c0_i32_1 : i32, i32, i32
  }
  func.func @transform_16(%arg0: i32) -> (i32, i32, i32) {
    %c0_i32 = arith.constant 0 : i32
    %c0_i32_0 = arith.constant 0 : i32
    %c0_i32_1 = arith.constant 0 : i32
    %c0_i32_2 = arith.constant 0 : i32
    return %c0_i32, %c0_i32_0, %c0_i32_1 : i32, i32, i32
  }
  func.func @transform_17(%arg0: i32) -> (i32, i32, i32) {
    %c0_i32 = arith.constant 0 : i32
    %c0_i32_0 = arith.constant 0 : i32
    %c0_i32_1 = arith.constant 0 : i32
    %c0_i32_2 = arith.constant 0 : i32
    return %c0_i32, %c0_i32_0, %c0_i32_1 : i32, i32, i32
  }
  func.func @transform_18(%arg0: i32) -> (i32, i32, i32) {
    %c0_i32 = arith.constant 0 : i32
    %c0_i32_0 = arith.constant 0 : i32
    %c0_i32_1 = arith.constant 0 : i32
    %c0_i32_2 = arith.constant 0 : i32
    return %c0_i32, %c0_i32_0, %c0_i32_1 : i32, i32, i32
  }
  func.func @transform_19(%arg0: i32) -> (i32, i32, i32) {
    %c0_i32 = arith.constant 0 : i32
    %c0_i32_0 = arith.constant 0 : i32
    %c0_i32_1 = arith.constant 0 : i32
    %c0_i32_2 = arith.constant 0 : i32
    return %c0_i32, %c0_i32_0, %c0_i32_1 : i32, i32, i32
  }
  func.func @transform_20(%arg0: i32) -> (i32, i32, i32) {
    %c0_i32 = arith.constant 0 : i32
    %c0_i32_0 = arith.constant 0 : i32
    %c0_i32_1 = arith.constant 0 : i32
    %c0_i32_2 = arith.constant 0 : i32
    return %c0_i32, %c0_i32_0, %c0_i32_1 : i32, i32, i32
  }
  func.func @transform_21(%arg0: i32) -> (i32, i32, i32) {
    %c0_i32 = arith.constant 0 : i32
    %c0_i32_0 = arith.constant 0 : i32
    %c0_i32_1 = arith.constant 0 : i32
    %c0_i32_2 = arith.constant 0 : i32
    return %c0_i32, %c0_i32_0, %c0_i32_1 : i32, i32, i32
  }
  func.func @transform_22(%arg0: i32) -> (i32, i32, i32) {
    %c0_i32 = arith.constant 0 : i32
    %c0_i32_0 = arith.constant 0 : i32
    %c0_i32_1 = arith.constant 0 : i32
    return %arg0, %c0_i32, %c0_i32_0 : i32, i32, i32
  }
}

</mosaic_0001>

<bundles_post_ra>
// kernel: tpu_custom_call.1
= control target key start
LH: loop header
LB: loop body
LE: loop exit
PB: predicated region body
PF: predicated region fallthrough
CT: control target
= control target key end

     0   :  { %s4137_s0 = inlined_call_operand.vmem [shape: s32[2,8,1], index: 0, kind: input, shape index: {}]   ;;  %s4138_s1 = inlined_call_operand.vmem [shape: f32[2,1,8], index: 1, kind: input, shape index: {}]   ;;  %s4139_s2 = inlined_call_operand.vmem [shape: f32[8,32], index: 2, kind: input, shape index: {}]   ;;  %s4140_s3 = inlined_call_operand.vmem [shape: f32[1,32], index: 3, kind: input, shape index: {}]   ;;  %s4141_s4 = inlined_call_operand.vmem [shape: f32[1,32], index: 4, kind: input, shape index: {}]   ;;  %s4142_s5 = inlined_call_operand.vmem [shape: bf16[128,32], index: 5, kind: input, shape index: {}]   ;;  %s4143_s6 = inlined_call_operand.vmem [shape: bf16[2,4,32,8], index: 6, kind: input, shape index: {}]   ;;  %s4144_s7 = inlined_call_operand.vmem [shape: bf16[2,4,32,8], index: 7, kind: input, shape index: {}]   ;;  %s4145_s8 = inlined_call_operand.vmem [shape: bf16[2,4,32,8], index: 8, kind: input, shape index: {}]   ;;  %s4146_s9 = inlined_call_operand.vmem [shape: f32[2,4,1,8], index: 9, kind: input, shape index: {}]   ;;  %s4147_s10 = inlined_call_operand.vmem [shape: f32[2,4,1,8], index: 10, kind: input, shape index: {}]   ;;  %s4148_s11 = inlined_call_operand.vmem [shape: f32[2,4,1,8], index: 11, kind: input, shape index: {}]   ;;  %s4149_s12 = inlined_call_operand.vmem [shape: bf16[2,4,8,32], index: 12, kind: input, shape index: {}]   ;;  %s4150_s13 = inlined_call_operand.vmem [shape: f32[2,1,32], index: 13, kind: input, shape index: {}]   ;;  %s4151_s14 = inlined_call_operand.vmem [shape: f32[2,1,32], index: 14, kind: input, shape index: {}]   ;;  %s4152_s15 = inlined_call_operand.vmem [shape: f32[2,1,32], index: 15, kind: input, shape index: {}]   ;;  %s4153_s16 = inlined_call_operand.vmem [shape: bf16[2,32,64], index: 16, kind: input, shape index: {}]   ;;  %s4154_s17 = inlined_call_operand.vmem [shape: f32[2,1,64], index: 17, kind: input, shape index: {}]   ;;  %s4155_s18 = inlined_call_operand.vmem [shape: bf16[2,64,32], index: 18, kind: input, shape index: {}]   ;;  %s4156_s19 = inlined_call_operand.vmem [shape: f32[2,1,32], index: 19, kind: input, shape index: {}]   ;;  %s4157_s20 = inlined_call_operand.vmem [shape: f32[2,1,32], index: 20, kind: input, shape index: {}]   ;;  %s4158_s21 = inlined_call_operand.vmem [shape: f32[2,1,32], index: 21, kind: input, shape index: {}]   ;;  %s4159_s22 = inlined_call_operand.hbm [shape: f32[2,8,32], index: 22, kind: output, shape index: {}]  }
   0x1   :  { %4172 = sst [smem:[#allocation12_spill]] %s4137_s0 }
   0x2   :  { %4173 = sst [smem:[#allocation13_spill]] %s4138_s1 }
   0x3   :  { %4174 = sst [smem:[#allocation14_spill]] %s4139_s2 }
   0x4   :  { %4175 = sst [smem:[#allocation15_spill]] %s4140_s3 }
   0x5   :  { %4176 = sst [smem:[#allocation16_spill]] %s4141_s4 }
   0x6   :  { %4177 = sst [smem:[#allocation17_spill]] %s4142_s5 }
   0x7   :  { %4178 = sst [smem:[#allocation18_spill]] %s4143_s6 }
   0x8   :  { %4179 = sst [smem:[#allocation19_spill]] %s4144_s7 }
   0x9   :  { %4180 = sst [smem:[#allocation20_spill]] %s4145_s8 }
   0xa   :  { %4181 = sst [smem:[#allocation21_spill]] %s4159_s22 }
   0xb   :  { %27 = vsyncpa [#allocation3], 0 }
   0xc   :  { %29 = vsyncpa [#allocation3 + $0x1], 0  ;;  %s3559_s3 = smov 0   ;;  %s3561_s28 = smov 0  }
   0xd   :  { %s3563_s29 = smov 0   ;;  %s3565_s30 = smov 0  }
   0xe LB: > { %4182 = sst [smem:[#allocation5_spill]] %s3427_s3  ;;  %s3580_s4 = sadd.s32 4294967295, %s3439_s30   ;;  %s3439_s30 = sphi %s3565_s30, %s4206_s30   ;;  %s3435_s29 = sphi %s3563_s29, %s4208_s29   ;;  %s3431_s28 = sphi %s3561_s28, %s4210_s28   ;;  %s3427_s3 = sphi %s3559_s3, %s4209_s3  }
   0xf   : > { %4183 = sst [smem:[#allocation6_spill]] %s3435_s29  ;;  %s2750_s0 = sadd.s32 4294967294, %s3439_s30  }
  0x10   : > { %4184 = sst [smem:[#allocation7_spill]] %s3439_s30  ;;  %s3584_s23 = sadd.s32 1, %s3439_s30  }
  0x11   : > { %4185 = sst [smem:[#allocation8_spill]] %s3584_s23  ;;  %s514_s1 = sadd.s32 1, %s3435_s29 }
  0x12   : > { %s511_s5 = ssub.s32 %s3439_s30, %s3584_s23  ;;  %p524_p0 = scmp.ne.s32.totalorder %s3435_s29, %s3431_s28 }
  0x13   : > { %p512_p1 = scmp.eq.s32.totalorder %s511_s5, 0  ;;  %p525_p2 = scmp.eq.s32.totalorder %s3580_s4, 1 }
  0x14   : > { %p530_p3 = scmp.ne.s32.totalorder %s3431_s28, %s3427_s3  ;;  %p531_p4 = scmp.eq.s32.totalorder %s2750_s0, 1 }
  0x15   : > { %s3595_s24 = scalar_select %p512_p1, %s3435_s29, %s514_s1  }
  0x16   : > { %p3597_p5 = por %p525_p2, %p524_p0  ;;  %p3601_p6 = por %p531_p4, %p530_p3 }
  0x17   : > { %4186 = sst [smem:[#allocation9_spill]] %s3595_s24  ;;  %p2753_p7 = scmp.ge.s32.totalorder %s3439_s30, 1 }
  0x18   : > { %s4187_s6 = scalar_select %p3597_p5, 1, 0 }
  0x19   : > { %s4189_s25 = scalar_select %p3601_p6, 1, 0 }
  0x1a   : > { %4188 = sst [smem:[#allocation10_spill]] %s4187_s6  ;;  %p622_p8 = scmp.lt.s32.totalorder %s3439_s30, 3 }
  0x1b   : > { %4190 = sst [smem:[#allocation11_spill]] %s4189_s25 }
  0x1c   : > { %p623_p9 = pnand %p2753_p7, %p622_p8 }
  0x1d   : > { %p686_p10 = scmp.lt.s32.totalorder (!%p623_p9), %s3580_s4, 1  ;;  %s4191_s27 = sld [smem:[#allocation17_spill]] (!%p623_p9) }
  0x1e   : > { %626 = sbr.rel (%p623_p9) target bundleno = 3866 (0xf1a), region = 108  ;;  %s4192_s25 = sld [smem:[#allocation12_spill]] (!%p623_p9) }
  0x1f   : > { %s4193_s5 = sld [smem:[#allocation14_spill]] (!%p623_p9) }
  0x20   : > { %s4194_s1 = sld [smem:[#allocation18_spill]] (!%p623_p9) }
  0x21   : > { %s4195_s8 = sld [smem:[#allocation20_spill]] (!%p623_p9) }
  0x22   : > { %s4196_s7 = sld [smem:[#allocation19_spill]] (!%p623_p9) }
  0x23   : > { %v3185_v0 = vld [vmem:[%s4191_s27 + $0x38] sm:$0xff]  ;;  %v3441_v1 = vmov 0   ;;  %s3612_s0 = scalar_select %p686_p10, %s3580_s4, 1  ;;  %v3184_v2 = vld [vmem:[%s4191_s27 + $0x30] sm:$0xff]  ;;  %v3183_v3 = vld [vmem:[%s4191_s27 + $0x28] sm:$0xff]  ;;  %v695_v10 = vlaneseq  ;;  %vm784_vm2 = vcmask 261120  }
  0x24   : > { %3288 = vset.pattern.permute.xlu0 %v3441_v1  ;;  %769 = vmatpush.bf16.msra.mxu0 %v3185_v0  ;;  %v3182_v5 = vld [vmem:[%s4191_s27 + $0x20] sm:$0xff]  ;;  %v3181_v6 = vld [vmem:[%s4191_s27 + $0x18] sm:$0xff]  ;;  %v3180_v7 = vld [vmem:[%s4191_s27 + $0x10] sm:$0xff]  ;;  %v3442_v13 = vmov 1.0|1.0   ;;  %v3443_v19 = vmov 32.0  }
  0x25   : > { %s2755_s24 = sshll.u32 %s3612_s0, 3  ;;  %v3179_v8 = vld [vmem:[%s4191_s27 + $0x8] sm:$0xff]  ;;  %v3178_v9 = vld [vmem:[%s4191_s27] sm:$0xff]  ;;  %v696_v11 = vand.u32 127, %v695_v10  ;;  %3329 = vrcp.f32 %v3443_v19  ;;  %s4197_s22 = sld [smem:[#allocation15_spill]]  ;;  %vm1225_vm7 = vcmask 64512  }
  0x26   : > { %s689_s3 = scalar_lea.vmem %s4192_s25, %s2755_s24  ;;  %v720_v14 = vld [vmem:[%s4193_s5] sm:$0xff]  ;;  %v3187_v31 = vld [vmem:[%s4194_s1 + $0x8] sm:$0xff]  ;;  %v3189_v32 = vld [vmem:[%s4194_s1 + $0x18] sm:$0xff]  ;;  %s4198_s26 = sld [smem:[#allocation16_spill]]  ;;  %vm1488_vm8 = vcmask 1043456   ;;  %vm1690_vm12 = vcmask 523264  }
  0x27   : > { %v694_v4 = vld [vmem:[%s689_s3] sm:$0xff]  ;;  %v3191_v33 = vld [vmem:[%s4194_s1 + $0x28] sm:$0xff]  ;;  %v3205_v34 = vld [vmem:[%s4195_s8 + $0x18] sm:$0xff]  ;;  %879 = vmatpush.bf16.msra.mxu1 %v3187_v31  ;;  %904 = vmatpush.bf16.msra.mxu2 %v3189_v32  ;;  %s4199_s23 = sld [smem:[#allocation13_spill]]  ;;  %s3175_s5 = sshll.u32 %s3580_s4, 3 }
  0x28   : > { %770 = vmatpush.bf16.msra.mxu0 %v3184_v2  ;;  %698 = vperm.xlu0 %3288, %v694_v4   ;;  %v3186_v35 = vld [vmem:[%s4194_s1] sm:$0xff]  ;;  %v3188_v36 = vld [vmem:[%s4194_s1 + $0x10] sm:$0xff]  ;;  %v3193_v40 = vld [vmem:[%s4194_s1 + $0x38] sm:$0xff] }
  0x29   : > { %929 = vmatpush.bf16.msra.mxu3 %v3191_v33  ;;  %v3190_v37 = vld [vmem:[%s4194_s1 + $0x20] sm:$0xff]  ;;  %v3204_v38 = vld [vmem:[%s4195_s8 + $0x10] sm:$0xff]  ;;  %v3195_v41 = vld [vmem:[%s4196_s7 + $0x8] sm:$0xff] }
  0x2a   : > { %v3197_v42 = vld [vmem:[%s4196_s7 + $0x18] sm:$0xff]  ;;  %v3192_v44 = vld [vmem:[%s4194_s1 + $0x30] sm:$0xff]  ;;  %v3194_v45 = vld [vmem:[%s4196_s7] sm:$0xff] }
  0x2b   : > { %v3330_v20 = vpop.eup %3329  ;;  %880 = vmatpush.bf16.msra.mxu1 %v3186_v35  ;;  %905 = vmatpush.bf16.msra.mxu2 %v3188_v36  ;;  %v3196_v47 = vld [vmem:[%s4196_s7 + $0x10] sm:$0xff]  ;;  %v3289_v54 = vld [vmem:[%s4197_s22] ss:$0 sm:$0xff]  ;;  %v3199_v61 = vld [vmem:[%s4196_s7 + $0x28] sm:$0xff]  ;;  %s683_s22 = sand.u32 1, %s3431_s28  }
  0x2c   : > { %771 = vmatpush.bf16.msra.mxu0 %v3183_v3  ;;  %v789_v21 = vmul.f32 32.0, %v3330_v20  ;;  %vm793_vm3 = vweird.f32 %v3330_v20  ;;  %v3290_v56 = vld [vmem:[%s4198_s26] ss:$0 sm:$0xff]  ;;  %v3201_v62 = vld [vmem:[%s4196_s7 + $0x38] sm:$0xff]  ;;  %v3203_v63 = vld [vmem:[%s4195_s8 + $0x8] sm:$0xff]  ;;  %s2754_s25 = sshll.u32 %s683_s22, 3 }
  0x2d   : > { %930 = vmatpush.bf16.msra.mxu3 %v3190_v37  ;;  %v3198_v0 = vld [vmem:[%s4196_s7 + $0x20] sm:$0xff]  ;;  %v3200_v1 = vld [vmem:[%s4196_s7 + $0x30] sm:$0xff]  ;;  %v3207_v3 = vld [vmem:[%s4195_s8 + $0x28] sm:$0xff]  ;;  %s692_s30 = scalar_lea.vmem %s4199_s23, %s3612_s0  ;;  %s2667_s26 = scalar_lea.sflag [#allocation3], %s683_s22 }
  0x2e   : > { %v790_v22 = vsub.f32 1.0, %v789_v21  ;;  %v3202_v2 = vld [vmem:[%s4195_s8] sm:$0xff]  ;;  %v3209_v4 = vld [vmem:[%s4195_s8 + $0x38] sm:$0xff] }
  0x2f   : > { %954 = vmatpush.bf16.msrb.mxu1 %v3193_v40  ;;  %1011 = vmatpush.bf16.msrb.mxu2 %v3195_v41  ;;  %v3297_v19 = vld [vmem:[%s4147_s10 + $0x1] ss:$0 sm:$0xff]  ;;  %v3294_v33 = vld [vmem:[%s4146_s9 + $0x2] ss:$0 sm:$0xff]  ;;  %v3299_v36 = vld [vmem:[%s4147_s10 + $0x3] ss:$0 sm:$0xff] }
  0x30   : > { %772 = vmatpush.bf16.msra.mxu0 %v3182_v5  ;;  %v791_v23 = vmul.f32 %v3330_v20, %v790_v22  ;;  %v3206_v5 = vld [vmem:[%s4195_s8 + $0x20] sm:$0xff] }
  0x31   : > { %1036 = vmatpush.bf16.msrb.mxu3 %v3197_v42  ;;  %v3293_v22 = vld [vmem:[%s4146_s9 + $0x1] ss:$0 sm:$0xff] }
  0x32   : > { %v792_v24 = vadd.f32 %v3330_v20, %v791_v23 }
  0x33   : > { %955 = vmatpush.bf16.msrb.mxu1 %v3192_v44  ;;  %1012 = vmatpush.bf16.msrb.mxu2 %v3194_v45 }
  0x34   : > { %773 = vmatpush.bf16.msra.mxu0 %v3181_v6  ;;  %v3643_v25 = vsel %vm793_vm3, %v3330_v20, %v792_v24  ;;  %v3208_v6 = vld [vmem:[%s4195_s8 + $0x30] sm:$0xff]  ;;  %v3291_v20 = vld [vmem:[%s4146_s9] ss:$0 sm:$0xff] }
  0x35   : > { %1037 = vmatpush.bf16.msrb.mxu3 %v3196_v47 }
  0x38   : > { %774 = vmatpush.bf16.msra.mxu0 %v3180_v7  ;;  %v3292_v7 = vld [vmem:[%s4148_s11 + $0x1] ss:$0 sm:$0xff] }
  0x3c   : > { %775 = vmatpush.bf16.msra.mxu0 %v3179_v8 }
  0x40   : > { %776 = vmatpush.bf16.msra.mxu0 %v3178_v9 }
  0x44   : > { %1168 = vmatpush.bf16.msrb.mxu0 %v3205_v34 }
  0x48   : > { %1169 = vmatpush.bf16.msrb.mxu0 %v3204_v38  ;;  %v3300_v38 = vld [vmem:[%s4148_s11] ss:$0 sm:$0xff] }
  0x9a   : > { %v699_v12 = vpop.permute.xlu0 %698 }
  0x9b   : > { %vm700_vm0 = vcmp.eq.s32.totalorder %v696_v11, %v699_v12 }
  0x9c   : > { %vm2789_vm1 = vmpackc.low %vm700_vm0, %vm700_vm0 }
  0x9d   : > { %2790 = vmatmul.msk.bf16.vlgmr.msra.gmra.mxu0 %vm2789_vm1, %v3442_v13 }
 0x11a   : > { %v778_v15 = vpop.f32.mrf.mxu0 }
 0x11b   : > { %v779_v16 = vadd.f32 %v778_v15, %v720_v14 }
 0x11d   : > { %v785_v17 = vsel %vm784_vm2, %v779_v16, 0.0 }
 0x11e   : > { %786 = vadd.xlane.f32.xlu0 %v785_v17 }
 0x122   : > { %v780_v18 = vpop.f32.mrf.mxu0 }
 0x123   : > { %v3296_v18 = vld [vmem:[%s4147_s10] ss:$0 sm:$0xff] }
 0x191   : > { %v787_v26 = vpop.xlane.xlu0 %786 }
 0x192   : > { %v795_v27 = vmul.f32 %v3643_v25, %v787_v26 }
 0x194   : > { %v796_v28 = vsub.f32 %v779_v16, %v795_v27 }
 0x196   : > { %v797_v29 = vmul.f32 %v796_v28, %v796_v28 }
 0x198   : > { %v798_v30 = vsel %vm784_vm2, %v797_v29, 0.0 }
 0x199   : > { %799 = vadd.xlane.f32.xlu1 %v798_v30  ;;  %v3298_v30 = vld [vmem:[%s4147_s10 + $0x2] ss:$0 sm:$0xff] }
 0x20c   : > { %v800_v39 = vpop.xlane.xlu1 %799 }
 0x20d   : > { %v801_v43 = vmul.f32 %v800_v39, %v3643_v25  ;;  %v3295_v39 = vld [vmem:[%s4146_s9 + $0x3] ss:$0 sm:$0xff] }
 0x20f   : > { %v802_v46 = vadd.f32 1e-12, %v801_v43 }
 0x211   : > { %3331 = vrsqrt.f32 %v802_v46  ;;  %vm809_vm5 = vweird.f32 %v802_v46 }
 0x217   : > { %v3332_v48 = vpop.eup %3331 }
 0x218   : > { %v804_v49 = vmul.f32 %v3332_v48, %v802_v46  ;;  %vm810_vm4 = vweird.f32 %v3332_v48  ;;  %v3301_v46 = vld [vmem:[%s4148_s11 + $0x2] ss:$0 sm:$0xff] }
 0x219   : > { %vm811_vm6 = vmor %vm809_vm5, %vm810_vm4 }
 0x21a   : > { %v805_v50 = vmul.f32 %v3332_v48, %v804_v49 }
 0x21c   : > { %v806_v51 = vmul.f32 0.5, %v805_v50 }
 0x21e   : > { %v807_v52 = vsub.f32 1.5, %v806_v51  ;;  %v3302_v51 = vld [vmem:[%s4148_s11 + $0x3] ss:$0 sm:$0xff] }
 0x220   : > { %v808_v53 = vmul.f32 %v3332_v48, %v807_v52 }
 0x222   : > { %v812_v55 = vsel %vm811_vm6, %v3332_v48, %v808_v53 }
 0x223   : > { %v813_v57 = vmul.f32 %v812_v55, %v796_v28 }
 0x225   : > { %v817_v58 = vmul.f32 %v3289_v54, %v813_v57 }
 0x227   : > { %v3696_v59 = vadd.f32 %v3290_v56, %v817_v58  ;;  %v822_v56 = vld [vmem:[%s692_s30] sm:$0x1]  ;;  %s4200_s30 = sld [smem:[#allocation21_spill]] }
 0x228   : > { %v823_v57 = vsub.f32 1.0, %v822_v56 }
 0x229   : > { %v825_v60 = vpack.c.bf16 %v3696_v59, %v3696_v59 }
 0x22a   : > { %v824_v58 = vmul.f32 -1e+09, %v823_v57 }
 0x22b   : > { %2799 = vmatmul.msk.bf16.vlgmr.msra.gmra.mxu1 %vm784_vm2, %v825_v60  ;;  %2808 = vmatmul.msk.bf16.vlgmr.msra.gmra.mxu2 %vm784_vm2, %v825_v60 }
 0x22c   : > { %2817 = vmatmul.msk.bf16.vlgmr.msra.gmra.mxu3 %vm784_vm2, %v825_v60  ;;  %2880 = vmatmul.msk.bf16.vlgmr.msrb.gmra.mxu0 %vm784_vm2, %v825_v60 }
 0x22d   : > { %1061 = vmatpush.bf16.msra.mxu1 %v3199_v61  ;;  %1086 = vmatpush.bf16.msra.mxu2 %v3201_v62  ;;  %s4201_s0 = smov %s4200_s30  ;;  %s2677_s3 = scalar_lea.hbm %s4200_s30, %s3175_s5 }
 0x22e   : > { %1143 = vmatpush.bf16.msra.mxu3 %v3203_v63 }
 0x231   : > { %1062 = vmatpush.bf16.msra.mxu1 %v3198_v0  ;;  %1087 = vmatpush.bf16.msra.mxu2 %v3200_v1 }
 0x232   : > { %1144 = vmatpush.bf16.msra.mxu3 %v3202_v2 }
 0x23b   : > { %2826 = vmatmul.msk.bf16.vlgmr.msrb.gmra.mxu1 %vm784_vm2, %v825_v60  ;;  %2835 = vmatmul.msk.bf16.vlgmr.msrb.gmra.mxu2 %vm784_vm2, %v825_v60 }
 0x23c   : > { %2844 = vmatmul.msk.bf16.vlgmr.msrb.gmra.mxu3 %vm784_vm2, %v825_v60  ;;  %1193 = vmatpush.bf16.msrb.mxu1 %v3207_v3 }
 0x23d   : > { %1218 = vmatpush.bf16.msrb.mxu2 %v3209_v4 }
 0x240   : > { %1194 = vmatpush.bf16.msrb.mxu1 %v3206_v5 }
 0x241   : > { %1219 = vmatpush.bf16.msrb.mxu2 %v3208_v6 }
 0x24b   : > { %2853 = vmatmul.msk.bf16.vlgmr.msra.gmra.mxu1 %vm784_vm2, %v825_v60  ;;  %2862 = vmatmul.msk.bf16.vlgmr.msra.gmra.mxu2 %vm784_vm2, %v825_v60 }
 0x24c   : > { %2871 = vmatmul.msk.bf16.vlgmr.msra.gmra.mxu3 %vm784_vm2, %v825_v60 }
 0x25b   : > { %2889 = vmatmul.msk.bf16.vlgmr.msrb.gmra.mxu1 %vm784_vm2, %v825_v60  ;;  %2898 = vmatmul.msk.bf16.vlgmr.msrb.gmra.mxu2 %vm784_vm2, %v825_v60  ;;  %v3790_v60 = vperm.slane %v824_v58, 0 }
 0x2a8   : > { %v882_v8 = vpop.f32.mrf.mxu1 }
 0x2a9   : > { %v1171_v9 = vpop.f32.mrf.mxu0  ;;  %v883_v28 = vadd.f32 %v3291_v20, %v882_v8 }
 0x2aa   : > { %v1172_v10 = vadd.f32 %v3292_v7, %v1171_v9 }
 0x2ac   : > { %1426 = vmatpush.msra.mxu2 %v1172_v10 }
 0x2ae   : > { %v907_v11 = vpop.f32.mrf.mxu2 }
 0x2af   : > { %v932_v12 = vpop.f32.mrf.mxu3  ;;  %v908_v29 = vadd.f32 %v3293_v22, %v907_v11 }
 0x2b0   : > { %v884_v13 = vpop.f32.mrf.mxu1  ;;  %v933_v37 = vadd.f32 %v3294_v33, %v932_v12 }
 0x2b1   : > { %v1173_v14 = vpop.f32.mrf.mxu0 }
 0x2b6   : > { %v909_v15 = vpop.f32.mrf.mxu2 }
 0x2b7   : > { %v934_v16 = vpop.f32.mrf.mxu3 }
 0x2b8   : > { %v957_v17 = vpop.f32.mrf.mxu1 }
 0x2b9   : > { %v958_v45 = vadd.f32 %v3295_v39, %v957_v17 }
 0x2be   : > { %v1014_v21 = vpop.f32.mrf.mxu2 }
 0x2bf   : > { %v1015_v23 = vadd.f32 %v3296_v18, %v1014_v21  ;;  %v1039_v24 = vpop.f32.mrf.mxu3 }
 0x2c0   : > { %v1040_v26 = vadd.f32 %v3297_v19, %v1039_v24  ;;  %v959_v27 = vpop.f32.mrf.mxu1 }
 0x2c1   : > { %2899 = vmatpush.xpose.msk.msrb.mxu3 %vm1225_vm7, %v1015_v23 }
 0x2c2   : > { %2901 = vmatpush.xpose.msk.msra.mxu0 %vm1225_vm7, %v1040_v26 }
 0x2c4   : > { %2900 = vmatmul.msk.f32.vlgmr.msrb.gmra.mxu3 %vm1225_vm7, %v883_v28 }
 0x2c5   : > { %2902 = vmatmul.msk.f32.vlgmr.msra.gmra.mxu0 %vm1225_vm7, %v908_v29 }
 0x2c6   : > { %v1016_v31 = vpop.f32.mrf.mxu2 }
 0x2c7   : > { %v1041_v32 = vpop.f32.mrf.mxu3 }
 0x2c8   : > { %v1064_v34 = vpop.f32.mrf.mxu1 }
 0x2c9   : > { %v1065_v35 = vadd.f32 %v3298_v30, %v1064_v34 }
 0x2cb   : > { %2903 = vmatpush.xpose.msk.msra.mxu3 %vm1225_vm7, %v1065_v35 }
 0x2ce   : > { %v1089_v40 = vpop.f32.mrf.mxu2  ;;  %2904 = vmatmul.msk.f32.vlgmr.msra.gmra.mxu3 %vm1225_vm7, %v933_v37 }
 0x2cf   : > { %v1090_v41 = vadd.f32 %v3299_v36, %v1089_v40  ;;  %v1146_v42 = vpop.f32.mrf.mxu3 }
 0x2d0   : > { %v1147_v43 = vadd.f32 %v3300_v38, %v1146_v42  ;;  %v1066_v44 = vpop.f32.mrf.mxu1 }
 0x2d1   : > { %2905 = vmatpush.xpose.msk.msrb.mxu0 %vm1225_vm7, %v1090_v41 }
 0x2d2   : > { %1403 = vmatpush.msrb.mxu3 %v1147_v43 }
 0x2d4   : > { %2906 = vmatmul.msk.f32.vlgmr.msrb.gmra.mxu0 %vm1225_vm7, %v958_v45 }
 0x2d6   : > { %v1091_v47 = vpop.f32.mrf.mxu2 }
 0x2d7   : > { %v1148_v48 = vpop.f32.mrf.mxu3 }
 0x2d8   : > { %v1196_v49 = vpop.f32.mrf.mxu1  ;;  %v1481_v48 = vld [vmem:[%s4149_s12] sm:$0xf] }
 0x2d9   : > { %v1197_v50 = vadd.f32 %v3301_v46, %v1196_v49  ;;  %v1482_v46 = vld [vmem:[%s4149_s12 + $0x4] sm:$0xf]  ;;  %v1490_v49 = vsel %vm1488_vm8, %v1481_v48, 0 }
 0x2da   : > { %v1509_v47 = vsel %vm1488_vm8, %v1482_v46, 0  ;;  %1499 = vmatpush.bf16.msra.mxu1 %v1490_v49  ;;  %v3306_v46 = vld [vmem:[%s4154_s17] ss:$0 sm:$0xff] }
 0x2db   : > { %1449 = vmatpush.msra.mxu3 %v1197_v50  ;;  %1518 = vmatpush.bf16.msrb.mxu2 %v1509_v47  ;;  %v1484_v50 = vld [vmem:[%s4149_s12 + $0xc] sm:$0xf] }
 0x2de   : > { %v1221_v52 = vpop.f32.mrf.mxu2 }
 0x2df   : > { %v1222_v53 = vadd.f32 %v3302_v51, %v1221_v52  ;;  %v1547_v51 = vsel %vm1488_vm8, %v1484_v50, 0  ;;  %v1483_v52 = vld [vmem:[%s4149_s12 + $0x8] sm:$0xf] }
 0x2e0   : > { %v1198_v54 = vpop.f32.mrf.mxu1 }
 0x2e1   : > { %1472 = vmatpush.msra.mxu0 %v1222_v53  ;;  %v1528_v53 = vsel %vm1488_vm8, %v1483_v52, 0 }
 0x2e3   : > { %1556 = vmatpush.bf16.msrb.mxu0 %v1547_v51 }
 0x2e6   : > { %v1223_v55 = vpop.f32.mrf.mxu2 }
 0x342   : > { %v1275_v61 = vpop.f32.mrf.mxu0 }
 0x343   : > { %v1331_v62 = vmul.f32 0.35355338, %v1275_v61 }
 0x345   : > { %v1338_v63 = vadd.f32 %v3790_v60, %v1331_v62 }
 0x347   : > { %v1344_v0 = vsel %vm1225_vm7, %v1338_v63, -inf  ;;  %v1249_v1 = vpop.f32.mrf.mxu3 }
 0x348   : > { %1345 = vmax.xlane.f32.xlu2 %v1344_v0  ;;  %v1330_v2 = vmul.f32 0.35355338, %v1249_v1 }
 0x34a   : > { %v1337_v3 = vadd.f32 %v3790_v60, %v1330_v2 }
 0x34c   : > { %v1341_v4 = vsel %vm1225_vm7, %v1337_v3, -inf }
 0x34d   : > { %1342 = vmax.xlane.f32.xlu1 %v1341_v4 }
 0x351   : > { %v1301_v5 = vpop.f32.mrf.mxu3  ;;  %v1327_v6 = vpop.f32.mrf.mxu0 }
 0x352   : > { %v1332_v7 = vmul.f32 0.35355338, %v1301_v5  ;;  %v1333_v8 = vmul.f32 0.35355338, %v1327_v6 }
 0x354   : > { %v1340_v9 = vadd.f32 %v3790_v60, %v1333_v8  ;;  %v1339_v10 = vadd.f32 %v3790_v60, %v1332_v7 }
 0x356   : > { %v1350_v11 = vsel %vm1225_vm7, %v1340_v9, -inf  ;;  %v1347_v12 = vsel %vm1225_vm7, %v1339_v10, -inf }
 0x357   : > { %1351 = vmax.xlane.f32.xlu1 %v1350_v11  ;;  %1348 = vmax.xlane.f32.xlu2 %v1347_v12  ;;  %v3303_v12 = vld [vmem:[%s4150_s13] ss:$0 sm:$0xff] }
 0x3bb   : > { %v1346_v13 = vpop.xlane.xlu2 %1345 }
 0x3bc   : > { %v1354_v14 = vsub.f32 %v1338_v63, %v1346_v13 }
 0x3be   : > { %v1359_v15 = vmul.f32 1.442695, %v1354_v14 }
 0x3c0   : > { %3333 = vpow2.f32 %v1359_v15  ;;  %v1343_v16 = vpop.xlane.xlu1 %1342 }
 0x3c1   : > { %v1353_v17 = vsub.f32 %v1337_v3, %v1343_v16 }
 0x3c3   : > { %v1357_v18 = vmul.f32 1.442695, %v1353_v17 }
 0x3c5   : > { %3335 = vpow2.f32 %v1357_v18 }
 0x3c6   : > { %v3334_v19 = vpop.eup %3333 }
 0x3c7   : > { %v1368_v20 = vsel %vm1225_vm7, %v3334_v19, 0.0 }
 0x3c8   : > { %1369 = vadd.xlane.f32.xlu1 %v1368_v20 }
 0x3ca   : > { %v1352_v21 = vpop.xlane.xlu1 %1351  ;;  %v1349_v22 = vpop.xlane.xlu2 %1348 }
 0x3cb   : > { %v3336_v23 = vpop.eup %3335  ;;  %v1356_v24 = vsub.f32 %v1340_v9, %v1352_v21  ;;  %v1355_v26 = vsub.f32 %v1339_v10, %v1349_v22 }
 0x3cc   : > { %v1365_v27 = vsel %vm1225_vm7, %v3336_v23, 0.0 }
 0x3cd   : > { %v1363_v28 = vmul.f32 1.442695, %v1356_v24  ;;  %v1361_v29 = vmul.f32 1.442695, %v1355_v26  ;;  %1366 = vadd.xlane.f32.xlu2 %v1365_v27  ;;  %v3211_v24 = vld [vmem:[%s4153_s16 + $0x8] sm:$0xff] }
 0x3ce   : > { %1637 = vmatpush.bf16.msrb.mxu1 %v3211_v24  ;;  %v3226_v24 = vld [vmem:[%s4196_s7 + $0x50] sm:$0xff] }
 0x3cf   : > { %3337 = vpow2.f32 %v1363_v28 }
 0x3d0   : > { %3339 = vpow2.f32 %v1361_v29 }
 0x3d5   : > { %v3338_v30 = vpop.eup %3337 }
 0x3d6   : > { %v3340_v31 = vpop.eup %3339  ;;  %v1374_v32 = vsel %vm1225_vm7, %v3338_v30, 0.0 }
 0x3d7   : > { %1375 = vadd.xlane.f32.xlu1 %v1374_v32  ;;  %v1371_v33 = vsel %vm1225_vm7, %v3340_v31, 0.0 }
 0x3d8   : > { %1372 = vadd.xlane.f32.xlu2 %v1371_v33 }
 0x43b   : > { %v1370_v34 = vpop.xlane.xlu1 %1369 }
 0x43c   : > { %3341 = vrcp.f32 %v1370_v34 }
 0x440   : > { %v1367_v35 = vpop.xlane.xlu2 %1366 }
 0x441   : > { %3343 = vrcp.f32 %v1367_v35  ;;  %v3304_v35 = vld [vmem:[%s4151_s14] ss:$0 sm:$0xff] }
 0x442   : > { %v3342_v36 = vpop.eup %3341 }
 0x443   : > { %v1382_v37 = vmul.f32 %v3342_v36, %v3334_v19 }
 0x445   : > { %2908 = vmatmul.msk.f32.vlgmr.msra.gmra.mxu2 %vm1225_vm7, %v1382_v37  ;;  %v3305_v37 = vld [vmem:[%s4152_s15] ss:$0 sm:$0xff] }
 0x447   : > { %v3344_v38 = vpop.eup %3343 }
 0x448   : > { %v1381_v39 = vmul.f32 %v3344_v38, %v3336_v23 }
 0x44a   : > { %v1376_v40 = vpop.xlane.xlu1 %1375  ;;  %2907 = vmatmul.msk.f32.vlgmr.msrb.gmra.mxu3 %vm1225_vm7, %v1381_v39 }
 0x44b   : > { %3345 = vrcp.f32 %v1376_v40  ;;  %v1373_v41 = vpop.xlane.xlu2 %1372  ;;  %1537 = vmatpush.bf16.msrb.mxu3 %v1528_v53 }
 0x44c   : > { %3347 = vrcp.f32 %v1373_v41 }
 0x451   : > { %v3346_v42 = vpop.eup %3345 }
 0x452   : > { %v3348_v43 = vpop.eup %3347  ;;  %v1384_v44 = vmul.f32 %v3346_v42, %v3338_v30  ;;  %v3215_v42 = vld [vmem:[%s4155_s18 + $0x18] sm:$0xff] }
 0x453   : > { %v1383_v45 = vmul.f32 %v3348_v43, %v3340_v31  ;;  %1698 = vmatpush.bf16.msra.mxu2 %v3215_v42  ;;  %v3214_v43 = vld [vmem:[%s4155_s18 + $0x10] sm:$0xff]  ;;  %v3235_v42 = vld [vmem:[%s4195_s8 + $0x58] sm:$0xff] }
 0x454   : > { %2910 = vmatmul.msk.f32.vlgmr.msra.gmra.mxu0 %vm1225_vm7, %v1384_v44  ;;  %v3213_v44 = vld [vmem:[%s4155_s18 + $0x8] sm:$0xff] }
 0x455   : > { %2909 = vmatmul.msk.f32.vlgmr.msra.gmra.mxu3 %vm1225_vm7, %v1383_v45  ;;  %v3212_v45 = vld [vmem:[%s4155_s18] sm:$0xff] }
 0x457   : > { %1699 = vmatpush.bf16.msra.mxu2 %v3214_v43  ;;  %v3237_v43 = vld [vmem:[%s4195_s8 + $0x68] sm:$0xff] }
 0x45b   : > { %1700 = vmatpush.bf16.msra.mxu2 %v3213_v44  ;;  %v3239_v44 = vld [vmem:[%s4195_s8 + $0x78] sm:$0xff] }
 0x45f   : > { %1701 = vmatpush.bf16.msra.mxu2 %v3212_v45  ;;  %v3232_v45 = vld [vmem:[%s4195_s8 + $0x40] sm:$0xff] }
 0x4c8   : > { %v1428_v54 = vpop.f32.mrf.mxu2 }
 0x4c9   : > { %v1478_v55 = vpack.c.bf16 %v1428_v54, %v1428_v54 }
 0x4cb   : > { %2912 = vmatmul.msk.bf16.vlgmr.msrb.gmra.mxu2 %vm1225_vm7, %v1478_v55 }
 0x4cd   : > { %v1405_v56 = vpop.f32.mrf.mxu3 }
 0x4ce   : > { %v1477_v57 = vpack.c.bf16 %v1405_v56, %v1405_v56 }
 0x4d0   : > { %2911 = vmatmul.msk.bf16.vlgmr.msra.gmra.mxu1 %vm1225_vm7, %v1477_v57 }
 0x4d1   : > { %v1474_v58 = vpop.f32.mrf.mxu0 }
 0x4d2   : > { %v1480_v61 = vpack.c.bf16 %v1474_v58, %v1474_v58 }
 0x4d4   : > { %2914 = vmatmul.msk.bf16.vlgmr.msrb.gmra.mxu0 %vm1225_vm7, %v1480_v61 }
 0x4d8   : > { %v1451_v62 = vpop.f32.mrf.mxu3 }
 0x4d9   : > { %v1479_v63 = vpack.c.bf16 %v1451_v62, %v1451_v62  ;;  %v3307_v62 = vld [vmem:[%s4156_s19] ss:$0 sm:$0xff] }
 0x4db   : > { %2913 = vmatmul.msk.bf16.vlgmr.msrb.gmra.mxu3 %vm1225_vm7, %v1479_v63 }
 0x54d   : > { %v1501_v0 = vpop.f32.mrf.mxu1 }
 0x54e   : > { %v1520_v1 = vpop.f32.mrf.mxu2  ;;  %v1562_v6 = vsel %vm784_vm2, %v1501_v0, 0.0 }
 0x54f   : > { %v1563_v7 = vsel %vm784_vm2, %v1520_v1, 0.0 }
 0x550   : > { %v1564_v8 = vadd.f32 %v1563_v7, %v1562_v6 }
 0x551   : > { %v1558_v2 = vpop.f32.mrf.mxu0 }
 0x552   : > { %v1567_v13 = vsel %vm784_vm2, %v1558_v2, 0.0 }
 0x555   : > { %v1503_v3 = vpop.f32.mrf.mxu1 }
 0x556   : > { %v1522_v4 = vpop.f32.mrf.mxu2 }
 0x559   : > { %v1560_v5 = vpop.f32.mrf.mxu0 }
 0x55e   : > { %v1539_v9 = vpop.f32.mrf.mxu3 }
 0x55f   : > { %v1565_v10 = vsel %vm784_vm2, %v1539_v9, 0.0  ;;  %v3217_v9 = vld [vmem:[%s4194_s1 + $0x48] sm:$0xff] }
 0x560   : > { %v1566_v11 = vadd.f32 %v1565_v10, %v1564_v8  ;;  %v3219_v10 = vld [vmem:[%s4194_s1 + $0x58] sm:$0xff]  ;;  %1796 = vmatpush.bf16.msra.mxu3 %v3217_v9 }
 0x561   : > { %1821 = vmatpush.bf16.msra.mxu0 %v3219_v10 }
 0x562   : > { %v1568_v14 = vadd.f32 %v1567_v13, %v1566_v11  ;;  %v3221_v11 = vld [vmem:[%s4194_s1 + $0x68] sm:$0xff]  ;;  %v3216_v13 = vld [vmem:[%s4194_s1 + $0x40] sm:$0xff] }
 0x564   : > { %v1573_v15 = vadd.f32 %v3303_v12, %v1568_v14  ;;  %v3223_v12 = vld [vmem:[%s4194_s1 + $0x78] sm:$0xff]  ;;  %v3218_v14 = vld [vmem:[%s4194_s1 + $0x50] sm:$0xff]  ;;  %1797 = vmatpush.bf16.msra.mxu3 %v3216_v13 }
 0x565   : > { %1871 = vmatpush.bf16.msrb.mxu2 %v3223_v12  ;;  %1822 = vmatpush.bf16.msra.mxu0 %v3218_v14 }
 0x566   : > { %v1541_v16 = vpop.f32.mrf.mxu3  ;;  %v1574_v17 = vadd.f32 %v1573_v15, %v3696_v59  ;;  %v3210_v59 = vld [vmem:[%s4153_s16] sm:$0xff] }
 0x567   : > { %1638 = vmatpush.bf16.msrb.mxu1 %v3210_v59  ;;  %v3220_v15 = vld [vmem:[%s4194_s1 + $0x60] sm:$0xff]  ;;  %v3222_v16 = vld [vmem:[%s4194_s1 + $0x70] sm:$0xff] }
 0x568   : > { %v1577_v18 = vsel %vm784_vm2, %v1574_v17, 0.0 }
 0x569   : > { %1578 = vadd.xlane.f32.xlu2 %v1577_v18  ;;  %1872 = vmatpush.bf16.msrb.mxu2 %v3222_v16  ;;  %v3225_v18 = vld [vmem:[%s4196_s7 + $0x48] sm:$0xff] }
 0x56a   : > { %1930 = vmatpush.bf16.msrb.mxu3 %v3225_v18  ;;  %v3311_v18 = vld [vmem:[%s4146_s9 + $0x6] ss:$0 sm:$0xff] }
 0x56b   : > { %1846 = vmatpush.bf16.msra.mxu1 %v3221_v11 }
 0x56f   : > { %1847 = vmatpush.bf16.msra.mxu1 %v3220_v15  ;;  %v3318_v15 = vld [vmem:[%s4148_s11 + $0x5] ss:$0 sm:$0xff] }
 0x5dc   : > { %v1579_v19 = vpop.xlane.xlu2 %1578 }
 0x5dd   : > { %v1580_v20 = vmul.f32 %v1579_v19, %v3643_v25  ;;  %v3227_v19 = vld [vmem:[%s4196_s7 + $0x58] sm:$0xff] }
 0x5de   : > { %1955 = vmatpush.bf16.msrb.mxu0 %v3227_v19 }
 0x5df   : > { %v1581_v21 = vsub.f32 %v1574_v17, %v1580_v20  ;;  %v3229_v20 = vld [vmem:[%s4196_s7 + $0x68] sm:$0xff] }
 0x5e1   : > { %v1582_v22 = vmul.f32 %v1581_v21, %v1581_v21 }
 0x5e2   : > { %1956 = vmatpush.bf16.msrb.mxu0 %v3226_v24 }
 0x5e3   : > { %v1583_v23 = vsel %vm784_vm2, %v1582_v22, 0.0  ;;  %v3231_v22 = vld [vmem:[%s4196_s7 + $0x78] sm:$0xff] }
 0x5e4   : > { %1584 = vadd.xlane.f32.xlu1 %v1583_v23  ;;  %v3224_v23 = vld [vmem:[%s4196_s7 + $0x40] sm:$0xff] }
 0x5e5   : > { %1931 = vmatpush.bf16.msrb.mxu3 %v3224_v23 }
 0x657   : > { %v1585_v26 = vpop.xlane.xlu1 %1584 }
 0x658   : > { %v1586_v27 = vmul.f32 %v1585_v26, %v3643_v25  ;;  %v3228_v26 = vld [vmem:[%s4196_s7 + $0x60] sm:$0xff] }
 0x65a   : > { %v1587_v28 = vadd.f32 1e-12, %v1586_v27  ;;  %v3230_v27 = vld [vmem:[%s4196_s7 + $0x70] sm:$0xff]  ;;  %s685_s7 = scalar_lea.vmem [#allocation2], %s2754_s25  ;;  %s3397_s25 = scalar_lea.hbm %s4201_s0, 16 }
 0x65b   : > { %s2679_s4 = sshll.u32 %s685_s7, 4  ;;  %s2680_s4 = int_to_ptr.vmem [resolvable:$true] %s2679_s4 }
 0x65c   : > { %3349 = vrsqrt.f32 %v1587_v28  ;;  %vm1594_vm10 = vweird.f32 %v1587_v28 }
 0x662   : > { %v3350_v29 = vpop.eup %3349 }
 0x663   : > { %v1589_v30 = vmul.f32 %v3350_v29, %v1587_v28  ;;  %vm1595_vm9 = vweird.f32 %v3350_v29 }
 0x664   : > { %vm1596_vm11 = vmor %vm1594_vm10, %vm1595_vm9 }
 0x665   : > { %v1590_v31 = vmul.f32 %v3350_v29, %v1589_v30 }
 0x667   : > { %v1591_v32 = vmul.f32 0.5, %v1590_v31 }
 0x669   : > { %v1592_v33 = vsub.f32 1.5, %v1591_v32 }
 0x66b   : > { %v1593_v34 = vmul.f32 %v3350_v29, %v1592_v33 }
 0x66d   : > { %v1597_v36 = vsel %vm1596_vm11, %v3350_v29, %v1593_v34  ;;  %v3308_v34 = vld [vmem:[%s4157_s20] ss:$0 sm:$0xff] }
 0x66e   : > { %v1598_v38 = vmul.f32 %v1597_v36, %v1581_v21  ;;  %v3309_v36 = vld [vmem:[%s4158_s21] ss:$0 sm:$0xff] }
 0x670   : > { %v1602_v39 = vmul.f32 %v3304_v35, %v1598_v38 }
 0x672   : > { %v1606_v40 = vadd.f32 %v3305_v37, %v1602_v39 }
 0x674   : > { %v1607_v41 = vpack.c.bf16 %v1606_v40, %v1606_v40 }
 0x676   : > { %2923 = vmatmul.msk.bf16.vlgmr.msrb.gmra.mxu1 %vm784_vm2, %v1607_v41  ;;  %v3233_v41 = vld [vmem:[%s4195_s8 + $0x48] sm:$0xff] }
 0x677   : > { %1980 = vmatpush.bf16.msrb.mxu1 %v3229_v20 }
 0x67b   : > { %1981 = vmatpush.bf16.msrb.mxu1 %v3228_v26  ;;  %v3321_v26 = vld [vmem:[%s4148_s11 + $0x7] ss:$0 sm:$0xff] }
 0x6f3   : > { %v1640_v47 = vpop.f32.mrf.mxu1 }
 0x6f4   : > { %v1641_v48 = vadd.f32 %v3306_v46, %v1640_v47  ;;  %v3234_v46 = vld [vmem:[%s4195_s8 + $0x50] sm:$0xff]  ;;  %v3236_v47 = vld [vmem:[%s4195_s8 + $0x60] sm:$0xff] }
 0x6f6   : > { %v1645_v49 = vmul.f32 0.044715, %v1641_v48  ;;  %v1644_v56 = vmul.f32 0.5, %v1641_v48 }
 0x6f8   : > { %v1646_v50 = vmul.f32 %v1645_v49, %v1641_v48 }
 0x6fa   : > { %v1647_v51 = vmul.f32 %v1646_v50, %v1641_v48 }
 0x6fb   : > { %v1642_v52 = vpop.f32.mrf.mxu1 }
 0x6fc   : > { %v1648_v53 = vadd.f32 %v1647_v51, %v1641_v48  ;;  %v3238_v48 = vld [vmem:[%s4195_s8 + $0x70] sm:$0xff]  ;;  %s2681_s8 = sshll.u32 %s2677_s3, 4  ;;  %s2682_s8 = int_to_ptr.hbm [resolvable:$true] %s2681_s8 }
 0x6fd   : > { %s3391_s2 = sshra.s32 %s2682_s8, 4  ;;  %s3392_s2 = int_to_ptr.hbm [resolvable:$true] %s3391_s2 }
 0x6fe   : > { %v1649_v54 = vmul.f32 0.7978846, %v1648_v53  ;;  %s3393_s5 = scalar_lea.hbm %s3392_s2, 8  ;;  %p3398_p0 = scmp.lt.s32.totalorder %s3392_s2, %s4201_s0 }
 0x6ff   : > { %p3394_p11 = scmp.ne.s32.totalorder %s3392_s2, %s3393_s5  ;;  %p3399_p1 = scmp.lt.s32.totalorder %s3397_s25, %s3393_s5 }
 0x700   : > { %3351 = vtanh.f32 %v1649_v54 }
 0x701   : > { %p3395_p12 = pnand %p3394_p11, %p3597_p5  ;;  %p3400_p2 = por %p3399_p1, %p3398_p0 }
 0x703   : > { %p3396_p13 = pneg %p3395_p12 }
 0x705   : > { %p3401_p3 = pnand %p3400_p2, %p3396_p13 }
 0x706   : > { %v3352_v55 = vpop.eup %3351 }
 0x707   : > { %v1651_v57 = vadd.f32 1.0, %v3352_v55  ;;  %v3314_v55 = vld [vmem:[%s4147_s10 + $0x5] ss:$0 sm:$0xff] }
 0x709   : > { %v1652_v58 = vmul.f32 %v1651_v57, %v1644_v56 }
 0x70b   : > { %v1653_v61 = vpack.c.bf16 %v1652_v58, %v1652_v58  ;;  %v3310_v58 = vld [vmem:[%s4146_s9 + $0x5] ss:$0 sm:$0xff] }
 0x70d   : > { %2940 = vmatmul.msk.bf16.vlgmr.msra.gmra.mxu2 %vm1690_vm12, %v1653_v61 }
 0x70e   : > { %2005 = vmatpush.bf16.msra.mxu2 %v3231_v22 }
 0x712   : > { %2006 = vmatpush.bf16.msra.mxu2 %v3230_v27 }
 0x790   : > { %v1703_v63 = vpop.f32.mrf.mxu2 }
 0x791   : > { %v1704_v0 = vadd.f32 %v3307_v62, %v1703_v63 }
 0x793   : > { %v1707_v1 = vadd.f32 %v1704_v0, %v1606_v40  ;;  %v3316_v0 = vld [vmem:[%s4147_s10 + $0x4] ss:$0 sm:$0xff] }
 0x795   : > { %v1710_v2 = vsel %vm784_vm2, %v1707_v1, 0.0 }
 0x796   : > { %1711 = vadd.xlane.f32.xlu2 %v1710_v2  ;;  %v3315_v2 = vld [vmem:[%s4147_s10 + $0x6] ss:$0 sm:$0xff] }
 0x798   : > { %v1705_v3 = vpop.f32.mrf.mxu2 }
 0x799   : > { %v3317_v3 = vld [vmem:[%s4147_s10 + $0x7] ss:$0 sm:$0xff] }
 0x809   : > { %v1712_v4 = vpop.xlane.xlu2 %1711 }
 0x80a   : > { %v1713_v5 = vmul.f32 %v1712_v4, %v3643_v25  ;;  %v3312_v4 = vld [vmem:[%s4146_s9 + $0x4] ss:$0 sm:$0xff] }
 0x80c   : > { %v1714_v6 = vsub.f32 %v1707_v1, %v1713_v5 }
 0x80e   : > { %v1715_v7 = vmul.f32 %v1714_v6, %v1714_v6 }
 0x810   : > { %v1716_v8 = vsel %vm784_vm2, %v1715_v7, 0.0 }
 0x811   : > { %1717 = vadd.xlane.f32.xlu1 %v1716_v8  ;;  %v3313_v8 = vld [vmem:[%s4146_s9 + $0x7] ss:$0 sm:$0xff] }
 0x884   : > { %v1718_v17 = vpop.xlane.xlu1 %1717 }
 0x885   : > { %v1719_v21 = vmul.f32 %v1718_v17, %v3643_v25  ;;  %v3319_v17 = vld [vmem:[%s4148_s11 + $0x6] ss:$0 sm:$0xff] }
 0x887   : > { %v1720_v59 = vadd.f32 1e-12, %v1719_v21 }
 0x889   : > { %3353 = vrsqrt.f32 %v1720_v59  ;;  %vm1727_vm14 = vweird.f32 %v1720_v59 }
 0x88f   : > { %v3354_v28 = vpop.eup %3353 }
 0x890   : > { %v1722_v29 = vmul.f32 %v3354_v28, %v1720_v59  ;;  %vm1728_vm13 = vweird.f32 %v3354_v28  ;;  %v3320_v59 = vld [vmem:[%s4148_s11 + $0x4] ss:$0 sm:$0xff] }
 0x891   : > { %vm1729_vm15 = vmor %vm1727_vm14, %vm1728_vm13 }
 0x892   : > { %v1723_v30 = vmul.f32 %v3354_v28, %v1722_v29 }
 0x894   : > { %v1724_v31 = vmul.f32 0.5, %v1723_v30 }
 0x896   : > { %v1725_v32 = vsub.f32 1.5, %v1724_v31 }
 0x898   : > { %v1726_v33 = vmul.f32 %v3354_v28, %v1725_v32 }
 0x89a   : > { %v1730_v35 = vsel %vm1729_vm15, %v3354_v28, %v1726_v33 }
 0x89b   : > { %v1731_v37 = vmul.f32 %v1730_v35, %v1714_v6 }
 0x89d   : > { %v1735_v38 = vmul.f32 %v3308_v34, %v1731_v37 }
 0x89f   : > { %v3930_v39 = vadd.f32 %v3309_v36, %v1735_v38 }
 0x8a1   : > { %v1740_v40 = vpack.c.bf16 %v3930_v39, %v3930_v39 }
 0x8a3   : > { %2969 = vmatmul.msk.bf16.vlgmr.msra.gmra.mxu3 %vm784_vm2, %v1740_v40  ;;  %2978 = vmatmul.msk.bf16.vlgmr.msra.gmra.mxu0 %vm784_vm2, %v1740_v40 }
 0x8a4   : > { %2987 = vmatmul.msk.bf16.vlgmr.msra.gmra.mxu1 %vm784_vm2, %v1740_v40  ;;  %2996 = vmatmul.msk.bf16.vlgmr.msrb.gmra.mxu2 %vm784_vm2, %v1740_v40 }
 0x8a5   : > { %2064 = vmatpush.bf16.msra.mxu3 %v3233_v41  ;;  %2089 = vmatpush.bf16.msra.mxu0 %v3235_v42 }
 0x8a6   : > { %2114 = vmatpush.bf16.msra.mxu1 %v3237_v43  ;;  %2139 = vmatpush.bf16.msrb.mxu2 %v3239_v44 }
 0x8a9   : > { %2065 = vmatpush.bf16.msra.mxu3 %v3232_v45  ;;  %2090 = vmatpush.bf16.msra.mxu0 %v3234_v46 }
 0x8aa   : > { %2115 = vmatpush.bf16.msra.mxu1 %v3236_v47  ;;  %2140 = vmatpush.bf16.msrb.mxu2 %v3238_v48 }
 0x8b3   : > { %3025 = vmatmul.msk.bf16.vlgmr.msrb.gmra.mxu3 %vm784_vm2, %v1740_v40  ;;  %3034 = vmatmul.msk.bf16.vlgmr.msrb.gmra.mxu0 %vm784_vm2, %v1740_v40 }
 0x8b4   : > { %3043 = vmatmul.msk.bf16.vlgmr.msrb.gmra.mxu1 %vm784_vm2, %v1740_v40  ;;  %3052 = vmatmul.msk.bf16.vlgmr.msra.gmra.mxu2 %vm784_vm2, %v1740_v40 }
 0x8c3   : > { %3081 = vmatmul.msk.bf16.vlgmr.msra.gmra.mxu3 %vm784_vm2, %v1740_v40  ;;  %3090 = vmatmul.msk.bf16.vlgmr.msra.gmra.mxu0 %vm784_vm2, %v1740_v40 }
 0x8c4   : > { %3099 = vmatmul.msk.bf16.vlgmr.msra.gmra.mxu1 %vm784_vm2, %v1740_v40  ;;  %3108 = vmatmul.msk.bf16.vlgmr.msrb.gmra.mxu2 %vm784_vm2, %v1740_v40 }
 0x920   : > { %v1824_v49 = vpop.f32.mrf.mxu0 }
 0x921   : > { %v1849_v50 = vpop.f32.mrf.mxu1  ;;  %v1825_v1 = vadd.f32 %v3310_v58, %v1824_v49 }
 0x922   : > { %v1850_v24 = vadd.f32 %v3311_v18, %v1849_v50 }
 0x926   : > { %v1799_v51 = vpop.f32.mrf.mxu3 }
 0x927   : > { %v1874_v52 = vpop.f32.mrf.mxu2  ;;  %v1800_v13 = vadd.f32 %v3312_v4, %v1799_v51 }
 0x928   : > { %v1826_v53 = vpop.f32.mrf.mxu0  ;;  %v1875_v14 = vadd.f32 %v3313_v8, %v1874_v52 }
 0x929   : > { %v1851_v54 = vpop.f32.mrf.mxu1 }
 0x92e   : > { %v1801_v56 = vpop.f32.mrf.mxu3 }
 0x92f   : > { %v1876_v57 = vpop.f32.mrf.mxu2 }
 0x930   : > { %v1958_v61 = vpop.f32.mrf.mxu0 }
 0x931   : > { %v1959_v62 = vadd.f32 %v3314_v55, %v1958_v61  ;;  %v1983_v63 = vpop.f32.mrf.mxu1 }
 0x932   : > { %v1984_v9 = vadd.f32 %v3315_v2, %v1983_v63 }
 0x933   : > { %3111 = vmatpush.xpose.msk.msrb.mxu0 %vm1225_vm7, %v1959_v62 }
 0x936   : > { %v1933_v5 = vpop.f32.mrf.mxu3  ;;  %3112 = vmatmul.msk.f32.vlgmr.msrb.gmra.mxu0 %vm1225_vm7, %v1825_v1 }
 0x937   : > { %v1934_v6 = vadd.f32 %v3316_v0, %v1933_v5  ;;  %v2008_v7 = vpop.f32.mrf.mxu2 }
 0x938   : > { %v2009_v10 = vadd.f32 %v3317_v3, %v2008_v7  ;;  %v1960_v11 = vpop.f32.mrf.mxu0 }
 0x939   : > { %v1985_v12 = vpop.f32.mrf.mxu1  ;;  %3109 = vmatpush.xpose.msk.msrb.mxu3 %vm1225_vm7, %v1934_v6 }
 0x93a   : > { %3115 = vmatpush.xpose.msk.msra.mxu0 %vm1225_vm7, %v2009_v10 }
 0x93c   : > { %3110 = vmatmul.msk.f32.vlgmr.msrb.gmra.mxu3 %vm1225_vm7, %v1800_v13 }
 0x93d   : > { %3113 = vmatpush.xpose.msk.msra.mxu3 %vm1225_vm7, %v1984_v9 }
 0x93e   : > { %v1935_v16 = vpop.f32.mrf.mxu3  ;;  %3116 = vmatmul.msk.f32.vlgmr.msra.gmra.mxu0 %vm1225_vm7, %v1875_v14 }
 0x93f   : > { %v2010_v19 = vpop.f32.mrf.mxu2 }
 0x940   : > { %v2092_v20 = vpop.f32.mrf.mxu0 }
 0x941   : > { %v2093_v21 = vadd.f32 %v3318_v15, %v2092_v20  ;;  %v2117_v22 = vpop.f32.mrf.mxu1 }
 0x942   : > { %v2118_v23 = vadd.f32 %v3319_v17, %v2117_v22 }
 0x943   : > { %2343 = vmatpush.msra.mxu2 %v2093_v21  ;;  %v3122_v21 = vld [vmem:[%s4149_s12 + $0x14] sm:$0xf] }
 0x944   : > { %2366 = vmatpush.msrb.mxu3 %v2118_v23  ;;  %v2426_v22 = vsel %vm1488_vm8, %v3122_v21, 0  ;;  %v3124_v23 = vld [vmem:[%s4149_s12 + $0x1c] sm:$0xf] }
 0x945   : > { %3114 = vmatmul.msk.f32.vlgmr.msra.gmra.mxu3 %vm1225_vm7, %v1850_v24  ;;  %2435 = vmatpush.bf16.msrb.mxu2 %v2426_v22  ;;  %v2464_v24 = vsel %vm1488_vm8, %v3124_v23, 0 }
 0x946   : > { %v2067_v27 = vpop.f32.mrf.mxu3 }
 0x947   : > { %v2068_v28 = vadd.f32 %v3320_v59, %v2067_v27  ;;  %v2142_v29 = vpop.f32.mrf.mxu2  ;;  %v3121_v59 = vld [vmem:[%s4149_s12 + $0x10] sm:$0xf]  ;;  %v3123_v27 = vld [vmem:[%s4149_s12 + $0x18] sm:$0xf] }
 0x948   : > { %v2143_v30 = vadd.f32 %v3321_v26, %v2142_v29  ;;  %v2094_v31 = vpop.f32.mrf.mxu0  ;;  %v2407_v26 = vsel %vm1488_vm8, %v3121_v59, 0 }
 0x949   : > { %v2119_v32 = vpop.f32.mrf.mxu1  ;;  %2320 = vmatpush.msrb.mxu1 %v2068_v28  ;;  %v2445_v28 = vsel %vm1488_vm8, %v3123_v27, 0 }
 0x94a   : > { %2389 = vmatpush.msrb.mxu0 %v2143_v30  ;;  %2454 = vmatpush.bf16.msra.mxu3 %v2445_v28 }
 0x94b   : > { %2416 = vmatpush.bf16.msra.mxu1 %v2407_v26 }
 0x94c   : > { %2473 = vmatpush.bf16.msra.mxu0 %v2464_v24 }
 0x94e   : > { %v2069_v33 = vpop.f32.mrf.mxu3 }
 0x94f   : > { %v2144_v34 = vpop.f32.mrf.mxu2 }
 0x9b3   : > { %v2195_v35 = vpop.f32.mrf.mxu0 }
 0x9b4   : > { %v2251_v36 = vmul.f32 0.35355338, %v2195_v35 }
 0x9b6   : > { %v2255_v37 = vadd.f32 %v2251_v36, %v3790_v60 }
 0x9b8   : > { %v2261_v38 = vsel %vm1225_vm7, %v2255_v37, -inf }
 0x9b9   : > { %2262 = vmax.xlane.f32.xlu2 %v2261_v38 }
 0x9bb   : > { %v2247_v40 = vpop.f32.mrf.mxu0 }
 0x9bc   : > { %v2253_v41 = vmul.f32 0.35355338, %v2247_v40 }
 0x9be   : > { %v2257_v42 = vadd.f32 %v2253_v41, %v3790_v60 }
 0x9bf   : > { %v2169_v43 = vpop.f32.mrf.mxu3 }
 0x9c0   : > { %v2250_v44 = vmul.f32 0.35355338, %v2169_v43  ;;  %v2267_v45 = vsel %vm1225_vm7, %v2257_v42, -inf }
 0x9c1   : > { %2268 = vmax.xlane.f32.xlu2 %v2267_v45 }
 0x9c2   : > { %v2254_v46 = vadd.f32 %v2250_v44, %v3790_v60 }
 0x9c4   : > { %v2258_v47 = vsel %vm1225_vm7, %v2254_v46, -inf }
 0x9c5   : > { %2259 = vmax.xlane.f32.xlu1 %v2258_v47 }
 0x9c8   : > { %v2221_v48 = vpop.f32.mrf.mxu3 }
 0x9c9   : > { %v2252_v49 = vmul.f32 0.35355338, %v2221_v48 }
 0x9cb   : > { %v2256_v50 = vadd.f32 %v2252_v49, %v3790_v60 }
 0x9cd   : > { %v2264_v51 = vsel %vm1225_vm7, %v2256_v50, -inf }
 0x9ce   : > { %2265 = vmax.xlane.f32.xlu0 %v2264_v51 }
 0xa2c   : > { %v2263_v52 = vpop.xlane.xlu2 %2262 }
 0xa2d   : > { %v2271_v53 = vsub.f32 %v2255_v37, %v2263_v52 }
 0xa2f   : > { %v2276_v54 = vmul.f32 1.442695, %v2271_v53 }
 0xa31   : > { %3355 = vpow2.f32 %v2276_v54 }
 0xa34   : > { %v2269_v55 = vpop.xlane.xlu2 %2268 }
 0xa35   : > { %v2273_v56 = vsub.f32 %v2257_v42, %v2269_v55 }
 0xa37   : > { %v3356_v57 = vpop.eup %3355  ;;  %v2280_v58 = vmul.f32 1.442695, %v2273_v56 }
 0xa38   : > { %v2260_v61 = vpop.xlane.xlu1 %2259  ;;  %v2285_v62 = vsel %vm1225_vm7, %v3356_v57, 0.0 }
 0xa39   : > { %3357 = vpow2.f32 %v2280_v58  ;;  %v2270_v63 = vsub.f32 %v2254_v46, %v2260_v61  ;;  %2286 = vadd.xlane.f32.xlu0 %v2285_v62 }
 0xa3b   : > { %v2274_v0 = vmul.f32 1.442695, %v2270_v63 }
 0xa3d   : > { %3359 = vpow2.f32 %v2274_v0  ;;  %v3241_v0 = vld [vmem:[%s4153_s16 + $0x18] sm:$0xff] }
 0xa3f   : > { %v3358_v60 = vpop.eup %3357 }
 0xa40   : > { %v2291_v1 = vsel %vm1225_vm7, %v3358_v60, 0.0 }
 0xa41   : > { %v2266_v2 = vpop.xlane.xlu0 %2265  ;;  %2292 = vadd.xlane.f32.xlu0 %v2291_v1 }
 0xa42   : > { %v2272_v3 = vsub.f32 %v2256_v50, %v2266_v2  ;;  %v3322_v50 = vld [vmem:[%s4150_s13 + $0x1] ss:$0 sm:$0xff] }
 0xa43   : > { %v3360_v4 = vpop.eup %3359 }
 0xa44   : > { %v2278_v5 = vmul.f32 1.442695, %v2272_v3  ;;  %v2282_v6 = vsel %vm1225_vm7, %v3360_v4, 0.0 }
 0xa45   : > { %2283 = vadd.xlane.f32.xlu2 %v2282_v6 }
 0xa46   : > { %3361 = vpow2.f32 %v2278_v5 }
 0xa4c   : > { %v3362_v7 = vpop.eup %3361 }
 0xa4d   : > { %v2288_v8 = vsel %vm1225_vm7, %v3362_v7, 0.0 }
 0xa4e   : > { %2289 = vadd.xlane.f32.xlu1 %v2288_v8 }
 0xaac   : > { %v2287_v9 = vpop.xlane.xlu0 %2286 }
 0xaad   : > { %3363 = vrcp.f32 %v2287_v9  ;;  %v3323_v9 = vld [vmem:[%s4151_s14 + $0x1] ss:$0 sm:$0xff] }
 0xab3   : > { %v3364_v10 = vpop.eup %3363 }
 0xab4   : > { %v2299_v11 = vmul.f32 %v3364_v10, %v3356_v57  ;;  %v2293_v12 = vpop.xlane.xlu0 %2292 }
 0xab5   : > { %3365 = vrcp.f32 %v2293_v12 }
 0xab6   : > { %3118 = vmatmul.msk.f32.vlgmr.msra.gmra.mxu2 %vm1225_vm7, %v2299_v11  ;;  %v3324_v11 = vld [vmem:[%s4152_s15 + $0x1] ss:$0 sm:$0xff] }
 0xab8   : > { %v2284_v13 = vpop.xlane.xlu2 %2283 }
 0xab9   : > { %3367 = vrcp.f32 %v2284_v13 }
 0xabb   : > { %v3366_v14 = vpop.eup %3365 }
 0xabc   : > { %v2301_v15 = vmul.f32 %v3366_v14, %v3358_v60 }
 0xabe   : > { %3120 = vmatmul.msk.f32.vlgmr.msrb.gmra.mxu0 %vm1225_vm7, %v2301_v15 }
 0xabf   : > { %v3368_v16 = vpop.eup %3367 }
 0xac0   : > { %v2298_v17 = vmul.f32 %v3368_v16, %v3360_v4  ;;  %v3245_v16 = vld [vmem:[%s4155_s18 + $0x38] sm:$0xff] }
 0xac1   : > { %v2290_v18 = vpop.xlane.xlu1 %2289  ;;  %2621 = vmatpush.bf16.msra.mxu2 %v3245_v16 }
 0xac2   : > { %3369 = vrcp.f32 %v2290_v18  ;;  %3117 = vmatmul.msk.f32.vlgmr.msrb.gmra.mxu1 %vm1225_vm7, %v2298_v17  ;;  %v3244_v17 = vld [vmem:[%s4155_s18 + $0x30] sm:$0xff]  ;;  %v3243_v18 = vld [vmem:[%s4155_s18 + $0x28] sm:$0xff] }
 0xac3   : > { %2559 = vmatpush.bf16.msrb.mxu1 %v3241_v0 }
 0xac5   : > { %2622 = vmatpush.bf16.msra.mxu2 %v3244_v17 }
 0xac8   : > { %v3370_v19 = vpop.eup %3369 }
 0xac9   : > { %v2300_v20 = vmul.f32 %v3370_v19, %v3362_v7  ;;  %2623 = vmatpush.bf16.msra.mxu2 %v3243_v18  ;;  %v3242_v19 = vld [vmem:[%s4155_s18 + $0x20] sm:$0xff] }
 0xacb   : > { %3119 = vmatmul.msk.f32.vlgmr.msrb.gmra.mxu3 %vm1225_vm7, %v2300_v20  ;;  %v3325_v20 = vld [vmem:[%s4154_s17 + $0x1] ss:$0 sm:$0xff] }
 0xacd   : > { %2624 = vmatpush.bf16.msra.mxu2 %v3242_v19 }
 0xb39   : > { %v2345_v29 = vpop.f32.mrf.mxu2 }
 0xb3a   : > { %v2395_v30 = vpack.c.bf16 %v2345_v29, %v2345_v29 }
 0xb3b   : > { %v2391_v31 = vpop.f32.mrf.mxu0 }
 0xb3c   : > { %v2397_v32 = vpack.c.bf16 %v2391_v31, %v2391_v31  ;;  %3126 = vmatmul.msk.bf16.vlgmr.msrb.gmra.mxu2 %vm1225_vm7, %v2395_v30 }
 0xb3e   : > { %3128 = vmatmul.msk.bf16.vlgmr.msra.gmra.mxu0 %vm1225_vm7, %v2397_v32 }
 0xb3f   : > { %v2322_v33 = vpop.f32.mrf.mxu1 }
 0xb40   : > { %v2394_v34 = vpack.c.bf16 %v2322_v33, %v2322_v33 }
 0xb42   : > { %3125 = vmatmul.msk.bf16.vlgmr.msra.gmra.mxu1 %vm1225_vm7, %v2394_v34  ;;  %v3326_v34 = vld [vmem:[%s4156_s19 + $0x1] ss:$0 sm:$0xff] }
 0xb4e   : > { %v2368_v35 = vpop.f32.mrf.mxu3 }
 0xb4f   : > { %v2396_v36 = vpack.c.bf16 %v2368_v35, %v2368_v35 }
 0xb51   : > { %3127 = vmatmul.msk.bf16.vlgmr.msra.gmra.mxu3 %vm1225_vm7, %v2396_v36 }
 0xbbb   : > { %v2475_v37 = vpop.f32.mrf.mxu0 }
 0xbbc   : > { %v2484_v51 = vsel %vm784_vm2, %v2475_v37, 0.0 }
 0xbbf   : > { %v2418_v38 = vpop.f32.mrf.mxu1  ;;  %v2437_v40 = vpop.f32.mrf.mxu2 }
 0xbc0   : > { %v2479_v44 = vsel %vm784_vm2, %v2418_v38, 0.0  ;;  %v2480_v45 = vsel %vm784_vm2, %v2437_v40, 0.0 }
 0xbc1   : > { %v2481_v46 = vadd.f32 %v2480_v45, %v2479_v44 }
 0xbc3   : > { %v2477_v41 = vpop.f32.mrf.mxu0 }
 0xbc7   : > { %v2420_v42 = vpop.f32.mrf.mxu1  ;;  %v2439_v43 = vpop.f32.mrf.mxu2 }
 0xbd4   : > { %v2456_v47 = vpop.f32.mrf.mxu3 }
 0xbd5   : > { %v2482_v48 = vsel %vm784_vm2, %v2456_v47, 0.0 }
 0xbd6   : > { %v2483_v49 = vadd.f32 %v2482_v48, %v2481_v46 }
 0xbd8   : > { %v2485_v52 = vadd.f32 %v2484_v51, %v2483_v49 }
 0xbda   : > { %v2491_v53 = vadd.f32 %v3322_v50, %v2485_v52 }
 0xbdc   : > { %v2458_v54 = vpop.f32.mrf.mxu3  ;;  %v2492_v55 = vadd.f32 %v2491_v53, %v3930_v39  ;;  %v3240_v39 = vld [vmem:[%s4153_s16 + $0x10] sm:$0xff] }
 0xbdd   : > { %2560 = vmatpush.bf16.msrb.mxu1 %v3240_v39 }
 0xbde   : > { %v2497_v56 = vsel %vm784_vm2, %v2492_v55, 0.0 }
 0xbdf   : > { %2498 = vadd.xlane.f32.xlu1 %v2497_v56 }
 0xc52   : > { %v2499_v57 = vpop.xlane.xlu1 %2498 }
 0xc53   : > { %v2500_v58 = vmul.f32 %v2499_v57, %v3643_v25  ;;  %v3328_v57 = vld [vmem:[%s4158_s21 + $0x1] ss:$0 sm:$0xff] }
 0xc55   : > { %v2501_v61 = vsub.f32 %v2492_v55, %v2500_v58  ;;  %v3327_v55 = vld [vmem:[%s4157_s20 + $0x1] ss:$0 sm:$0xff] }
 0xc57   : > { %v2502_v62 = vmul.f32 %v2501_v61, %v2501_v61 }
 0xc59   : > { %v2503_v63 = vsel %vm784_vm2, %v2502_v62, 0.0 }
 0xc5a   : > { %2504 = vadd.xlane.f32.xlu2 %v2503_v63 }
 0xccd   : > { %v2505_v60 = vpop.xlane.xlu2 %2504 }
 0xcce   : > { %v2506_v1 = vmul.f32 %v2505_v60, %v3643_v25 }
 0xcd0   : > { %v2507_v2 = vadd.f32 1e-12, %v2506_v1 }
 0xcd2   : > { %3371 = vrsqrt.f32 %v2507_v2  ;;  %vm2514_vm1 = vweird.f32 %v2507_v2 }
 0xcd8   : > { %v3372_v3 = vpop.eup %3371 }
 0xcd9   : > { %v2509_v4 = vmul.f32 %v3372_v3, %v2507_v2  ;;  %vm2515_vm0 = vweird.f32 %v3372_v3 }
 0xcda   : > { %vm2516_vm3 = vmor %vm2514_vm1, %vm2515_vm0 }
 0xcdb   : > { %v2510_v5 = vmul.f32 %v3372_v3, %v2509_v4 }
 0xcdd   : > { %v2511_v6 = vmul.f32 0.5, %v2510_v5 }
 0xcdf   : > { %v2512_v7 = vsub.f32 1.5, %v2511_v6 }
 0xce1   : > { %v2513_v8 = vmul.f32 %v3372_v3, %v2512_v7 }
 0xce3   : > { %v2517_v10 = vsel %vm2516_vm3, %v3372_v3, %v2513_v8 }
 0xce4   : > { %v2518_v12 = vmul.f32 %v2517_v10, %v2501_v61 }
 0xce6   : > { %v2522_v13 = vmul.f32 %v3323_v9, %v2518_v12 }
 0xce8   : > { %v2526_v14 = vadd.f32 %v3324_v11, %v2522_v13 }
 0xcea   : > { %v2527_v15 = vpack.c.bf16 %v2526_v14, %v2526_v14 }
 0xcec   : > { %3145 = vmatmul.msk.bf16.vlgmr.msrb.gmra.mxu1 %vm784_vm2, %v2527_v15 }
 0xd69   : > { %v2562_v21 = vpop.f32.mrf.mxu1 }
 0xd6a   : > { %v2563_v22 = vadd.f32 %v3325_v20, %v2562_v21 }
 0xd6c   : > { %v2567_v23 = vmul.f32 0.044715, %v2563_v22  ;;  %v2566_v30 = vmul.f32 0.5, %v2563_v22 }
 0xd6e   : > { %v2568_v24 = vmul.f32 %v2567_v23, %v2563_v22 }
 0xd70   : > { %v2569_v59 = vmul.f32 %v2568_v24, %v2563_v22 }
 0xd71   : > { %v2564_v26 = vpop.f32.mrf.mxu1 }
 0xd72   : > { %v2570_v27 = vadd.f32 %v2569_v59, %v2563_v22 }
 0xd74   : > { %v2571_v28 = vmul.f32 0.7978846, %v2570_v27 }
 0xd76   : > { %3373 = vtanh.f32 %v2571_v28 }
 0xd7c   : > { %v3374_v29 = vpop.eup %3373 }
 0xd7d   : > { %v2573_v31 = vadd.f32 1.0, %v3374_v29 }
 0xd7f   : > { %v2574_v32 = vmul.f32 %v2573_v31, %v2566_v30 }
 0xd81   : > { %v2575_v33 = vpack.c.bf16 %v2574_v32, %v2574_v32 }
 0xd83   : > { %3171 = vmatmul.msk.bf16.vlgmr.msra.gmra.mxu2 %vm1690_vm12, %v2575_v33 }
 0xe06   : > { %v2626_v35 = vpop.f32.mrf.mxu2 }
 0xe07   : > { %v2627_v36 = vadd.f32 %v3326_v34, %v2626_v35 }
 0xe09   : > { %v2630_v37 = vadd.f32 %v2627_v36, %v2526_v14 }
 0xe0b   : > { %v2635_v38 = vsel %vm784_vm2, %v2630_v37, 0.0 }
 0xe0c   : > { %2636 = vadd.xlane.f32.xlu0 %v2635_v38 }
 0xe0e   : > { %v2628_v40 = vpop.f32.mrf.mxu2 }
 0xe7f   : > { %v2637_v41 = vpop.xlane.xlu0 %2636 }
 0xe80   : > { %v2638_v42 = vmul.f32 %v2637_v41, %v3643_v25 }
 0xe82   : > { %v2639_v43 = vsub.f32 %v2630_v37, %v2638_v42 }
 0xe84   : > { %v2640_v44 = vmul.f32 %v2639_v43, %v2639_v43 }
 0xe86   : > { %v2641_v45 = vsel %vm784_vm2, %v2640_v44, 0.0 }
 0xe87   : > { %2642 = vadd.xlane.f32.xlu1 %v2641_v45 }
 0xefa   : > { %v2643_v46 = vpop.xlane.xlu1 %2642 }
 0xefb   : > { %v2644_v47 = vmul.f32 %v2643_v46, %v3643_v25 }
 0xefd   : > { %v2645_v48 = vadd.f32 1e-12, %v2644_v47 }
 0xeff   : > { %3375 = vrsqrt.f32 %v2645_v48  ;;  %vm2652_vm5 = vweird.f32 %v2645_v48 }
 0xf05   : > { %v3376_v49 = vpop.eup %3375 }
 0xf06   : > { %v2647_v50 = vmul.f32 %v3376_v49, %v2645_v48  ;;  %vm2653_vm4 = vweird.f32 %v3376_v49 }
 0xf07   : > { %vm2654_vm6 = vmor %vm2652_vm5, %vm2653_vm4 }
 0xf08   : > { %v2648_v51 = vmul.f32 %v3376_v49, %v2647_v50 }
 0xf0a   : > { %v2649_v52 = vmul.f32 0.5, %v2648_v51 }
 0xf0c   : > { %v2650_v53 = vsub.f32 1.5, %v2649_v52 }
 0xf0e   : > { %v2651_v54 = vmul.f32 %v3376_v49, %v2650_v53 }
 0xf10   : > { %v2655_v25 = vsel %vm2654_vm6, %v3376_v49, %v2651_v54 }
 0xf11   : > { %v2656_v56 = vmul.f32 %v2655_v25, %v2639_v43 }
 0xf13   : > { %v2660_v58 = vmul.f32 %v3327_v55, %v2656_v56 }
 0xf15   : > { %v2664_v61 = vadd.f32 %v3328_v57, %v2660_v58 }
 0xf17   : > { %2665 = vst.msk [vmem:[%s685_s7] sm:$0xff] %vm784_vm2, %v2664_v61 }
 0xf18   : > { %3404 = shalt.err (!%p3401_p3)
}
 0xf19   : > { %3246 = dma.vmem_to_hbm [thread:$0]  (%p3597_p5), %s2680_s4, 128, %s2682_s8, %s2667_s26  }
 0xf1a PF: > { %s4203_s7 = sld [smem:[#allocation7_spill]] }
 0xf1b   : > { %s4204_s22 = sld [smem:[#allocation5_spill]] }
 0xf20   : > { %p3252_p4 = scmp.ge.s32.totalorder %s4203_s7, 2 }
 0xf21   : > { %s2693_s6 = sand.u32 1, %s4204_s22  }
 0xf22   : > { %p3249_p7 = pnand %p3252_p4, %p3601_p6  ;;  %s2694_s29 = scalar_lea.sflag [#allocation3], %s2693_s6 }
 0xf24   : > { %p3250_p8 = pneg %p3249_p7 }
 0xf26   : > { %3422 = dma.done.wait (%p3250_p8), %s2694_s29, 128  }
 0xf27   : > { %3424 = vsyncadd (%p3250_p8), %s2694_s29, 4294967168  ;;  %s4206_s30 = sld [smem:[#allocation8_spill]]  ;;  %s4209_s3 = smov %s3431_s28 }
 0xf28   : > { %s4207_s2 = sld [smem:[#allocation6_spill]] }
 0xf29   : > { %s4208_s29 = sld [smem:[#allocation9_spill]] }
 0xf2d   : > { %p32_p9 = scmp.ge.s32.totalorder %s4206_s30, 4  }
 0xf2e   : > { %s4210_s28 = smov %s4207_s2 }
 0xf2f   :  { %34 = sbr.rel (!%p32_p9) target bundleno = 14 (0xe), region = 162 }
 0xf34   :  { %2700 = vsyncpa [#allocation3], 1 }
 0xf35   :  { %2702 = vsyncpa [#allocation3 + $0x1], 1 }

</bundles_post_ra>
